<compile_context>
chip_gen: v7x
topology: tpu7x:2x2x1
jax: 0.10.0
libtpu: 0.0.40
codegen_flags: <defaults>
</compile_context>

<pallas_src>
import math

import jax
import jax.numpy as jnp
from jax.experimental import pallas as pl
from jax.experimental.pallas import tpu as pltpu

# Logical network dimensions fixed by the module (small=False, dim_out=47)
DIMS = [784, 170, 130, 100, 70, 47]
# Lane-dense (multiple-of-128) padded widths
PAD_IN = 896                          # 784 -> 896 input features
PDIMS = [256, 256, 128, 128, 128]     # padded widths of y1..y5
KDIMS = [PAD_IN] + PDIMS[:-1]         # padded K dims of W1..W5

BETA = 10.0
INV_BETA = 0.1
THRESHOLD = 20.0

MAX_TB = 512                          # max batch rows per grid step
VMEM_LIMIT_BYTES = 32 * 1024 * 1024   # fits TB=512 double-buffered on v5e/v6e/v7x


def _softplus_beta(x):
    """PyTorch nn.Softplus(beta=10) with default threshold=20 (numerically stable)."""
    bx = BETA * x
    safe = jnp.log1p(jnp.exp(jnp.minimum(bx, THRESHOLD))) * INV_BETA
    return jnp.where(bx > THRESHOLD, x, safe)


def chemical_nn_kernel(x_ref, w1_ref, w2_ref, w3_ref, w4_ref, w5_ref,
                       y1_ref, y2_ref, y3_ref, y4_ref, y5_ref):
    """Fused 5-layer MLP forward on one batch tile.

    All matmuls hit the MXU with f32 accumulation.  Every output ref is a separate
    lane-dense (width multiple of 128) padded array, so all stores are unmasked vst.
    NOTE: for bit-level parity with the f32 PyTorch module, jnp.dot could be given
    precision=jax.lax.Precision.HIGHEST (~3x MXU cost); default precision passes
    1e-4 tolerances here.
    """
    y0 = x_ref[...]

    y1 = _softplus_beta(
        jnp.dot(y0, w1_ref[...], preferred_element_type=jnp.float32))
    y1_ref[...] = y1

    y2 = _softplus_beta(
        jnp.dot(y1, w2_ref[...], preferred_element_type=jnp.float32))
    y2_ref[...] = y2

    y3 = _softplus_beta(
        jnp.dot(y2, w3_ref[...], preferred_element_type=jnp.float32))
    y3_ref[...] = y3

    y4 = _softplus_beta(
        jnp.dot(y3, w4_ref[...], preferred_element_type=jnp.float32))
    y4_ref[...] = y4

    # Last layer: no activation (matches the PyTorch forward).
    y5_ref[...] = jnp.dot(y4, w5_ref[...], preferred_element_type=jnp.float32)


def _cdiv(a, b):
    return -(-a // b)


def _round_up(v, m):
    return ((v + m - 1) // m) * m


def _pad_weight(w, k_pad, n_pad):
    k, n = w.shape
    # Padded K rows MUST stay zero (see padding invariant at top of file).
    return jnp.pad(w, ((0, k_pad - k), (0, n_pad - n)))


@jax.jit
def chemical_nn_forward_padded(x, w1, w2, w3, w4, w5):
    """x: (B, 1, 784) float32. Weights wk are pre-transposed to (in, out).

    Returns (y0, (y1p, y2p, y3p, y4p, y5p)) where ykp are PADDED-width / padded-row
    arrays straight out of the kernel (no post-hoc slicing).  Performance-sensitive
    consumers should use this entry point and keep padded widths downstream; padded
    columns contain softplus(0) garbage and padded rows are meaningless.
    """
    y0 = jnp.squeeze(x, axis=1)  # (B, 784)
    B = y0.shape[0]

    # Tile sizing: derive the tile from the number of tiles so ragged batches are not
    # over-padded; force >=2 tiles (when possible) so the "parallel" grid axis actually
    # shards across v7x's two TensorCores.
    nt = _cdiv(B, MAX_TB)
    if B >= 16:
        nt = max(nt, 2)
    tb = _round_up(_cdiv(B, nt), 8)
    b_pad = _round_up(B, tb)
    nt = b_pad // tb

    # Pad rows to the tile grid and features 784 -> 896 (lane-dense load & matmul K).
    x_p = jnp.pad(y0, ((0, b_pad - B), (0, PAD_IN - DIMS[0])))

    # Zero-pad weights so every matmul K/N is a clean multiple of 128.
    ws_p = [_pad_weight(w, kd, nd)
            for w, kd, nd in zip((w1, w2, w3, w4, w5), KDIMS, PDIMS)]

    outs = pl.pallas_call(
        chemical_nn_kernel,
        grid=(nt,),
        in_specs=(
            # activation tile: one block of rows per grid step
            [pl.BlockSpec((tb, PAD_IN), lambda b: (b, 0))]
            # weights: constant block index -> loaded once, resident across steps
            + [pl.BlockSpec(w.shape, lambda b: (0, 0)) for w in ws_p]),
        out_specs=tuple(pl.BlockSpec((tb, pd), lambda b: (b, 0)) for pd in PDIMS),
        out_shape=tuple(jax.ShapeDtypeStruct((b_pad, pd), jnp.float32)
                        for pd in PDIMS),
        compiler_params=pltpu.CompilerParams(
            dimension_semantics=("parallel",),   # megacore sharding on v7x
            vmem_limit_bytes=VMEM_LIMIT_BYTES),
    )(x_p, *ws_p)

    return y0, outs


@jax.jit
def chemical_nn_forward(x, w1, w2, w3, w4, w5):
    """Module-faithful wrapper: returns ((y0, y1, y2, y3, y4), y5) at logical widths.

    The only post-kernel work is one narrow slice per layer output (far cheaper than
    the previous 5x re-read of a packed slab).  Consumers that tolerate padded widths
    should call chemical_nn_forward_padded directly and skip even this.
    """
    B = x.shape[0]
    y0, (y1p, y2p, y3p, y4p, y5p) = chemical_nn_forward_padded(
        x, w1, w2, w3, w4, w5)
    y1 = y1p[:B, :DIMS[1]]
    y2 = y2p[:B, :DIMS[2]]
    y3 = y3p[:B, :DIMS[3]]
    y4 = y4p[:B, :DIMS[4]]
    y5 = y5p[:B, :DIMS[5]]
    return ((y0, y1, y2, y3, y4), y5)


def init_weights(key):
    """nn.Linear-style init (bias=False): U(-1/sqrt(fan_in), +1/sqrt(fan_in)).

    Returned pre-transposed as (in_features, out_features) == W.T so the kernel
    computes x @ W (same math as the PyTorch module's x @ W.T).
    """
    weights = []
    for i in range(5):
        key, sub = jax.random.split(key)
        fan_in, fan_out = DIMS[i], DIMS[i + 1]
        bound = 1.0 / math.sqrt(fan_in)
        w = jax.random.uniform(sub, (fan_in, fan_out), jnp.float32,
                               minval=-bound, maxval=bound)
        weights.append(w)
    return weights


def reference_forward(x, weights):
    """Pure-JAX reference (unpadded) for correctness checks."""
    y0 = jnp.squeeze(x, axis=1)
    ys = [y0]
    h = y0
    for i, w in enumerate(weights):
        h = h @ w
        if i < 4:
            h = _softplus_beta(h)
            ys.append(h)
    return tuple(ys), h


def _check(B, key_x, weights):
    x = jax.random.normal(key_x, (B, 1, DIMS[0]), dtype=jnp.float32)
    hidden, logits = chemical_nn_forward(x, *weights)
    jax.block_until_ready(logits)
    for h in hidden:
        jax.block_until_ready(h)

    ref_hidden, ref_logits = reference_forward(x, weights)
    assert logits.shape == (B, DIMS[5])
    assert all(h.shape == r.shape for h, r in zip(hidden, ref_hidden))
    assert jnp.allclose(logits, ref_logits, atol=1e-4, rtol=1e-4)
    for h, r in zip(hidden, ref_hidden):
        assert jnp.allclose(h, r, atol=1e-4, rtol=1e-4)


if __name__ == "__main__":
    key = jax.random.PRNGKey(0)
    key_x1, key_x2, key_w = jax.random.split(key, 3)
    weights = init_weights(key_w)

    # Small batch (single tile) and a larger ragged batch (two tiles + row padding).
    _check(4, key_x1, weights)
    _check(600, key_x2, weights)

    print("KERNEL_OK")
</pallas_src>

<mosaic_0001>
module attributes {stable_mosaic.version = 11 : i64} {
  func.func @chemical_nn_kernel(%arg0: i32, %arg1: memref<8x896xf32, #tpu.memory_space<vmem>>, %arg2: memref<896x256xf32, #tpu.memory_space<vmem>>, %arg3: memref<256x256xf32, #tpu.memory_space<vmem>>, %arg4: memref<256x128xf32, #tpu.memory_space<vmem>>, %arg5: memref<128x128xf32, #tpu.memory_space<vmem>>, %arg6: memref<128x128xf32, #tpu.memory_space<vmem>>, %arg7: memref<8x256xf32, #tpu.memory_space<vmem>>, %arg8: memref<8x256xf32, #tpu.memory_space<vmem>>, %arg9: memref<8x128xf32, #tpu.memory_space<vmem>>, %arg10: memref<8x128xf32, #tpu.memory_space<vmem>>, %arg11: memref<8x128xf32, #tpu.memory_space<vmem>>) attributes {dimension_semantics = [#tpu.dimension_semantics<parallel>], iteration_bounds = array<i64: 1>, scalar_prefetch = 0 : i64, scratch_operands = 0 : i64, tpu.core_type = #tpu.core_type<tc>, window_params = [{transform_indices = @transform_0, window_bounds = array<i64: 8, 896>}, {pipeline_mode = #tpu.pipeline_mode<synchronous>, transform_indices = @transform_1, window_bounds = array<i64: 896, 256>}, {pipeline_mode = #tpu.pipeline_mode<synchronous>, transform_indices = @transform_2, window_bounds = array<i64: 256, 256>}, {pipeline_mode = #tpu.pipeline_mode<synchronous>, transform_indices = @transform_3, window_bounds = array<i64: 256, 128>}, {pipeline_mode = #tpu.pipeline_mode<synchronous>, transform_indices = @transform_4, window_bounds = array<i64: 128, 128>}, {pipeline_mode = #tpu.pipeline_mode<synchronous>, transform_indices = @transform_5, window_bounds = array<i64: 128, 128>}, {transform_indices = @transform_6, window_bounds = array<i64: 8, 256>}, {transform_indices = @transform_7, window_bounds = array<i64: 8, 256>}, {transform_indices = @transform_8, window_bounds = array<i64: 8, 128>}, {transform_indices = @transform_9, window_bounds = array<i64: 8, 128>}, {transform_indices = @transform_10, window_bounds = array<i64: 8, 128>}]} {
    %c0 = arith.constant 0 : index
    %c0_0 = arith.constant 0 : index
    %0 = vector.load %arg1[%c0, %c0_0] : memref<8x896xf32, #tpu.memory_space<vmem>>, vector<8x896xf32>
    %c0_1 = arith.constant 0 : index
    %c0_2 = arith.constant 0 : index
    %1 = vector.load %arg2[%c0_1, %c0_2] : memref<896x256xf32, #tpu.memory_space<vmem>>, vector<896x256xf32>
    %cst = arith.constant dense<0.000000e+00> : vector<8x256xf32>
    %2 = tpu.matmul %0, %1, %cst {dimension_numbers = #tpu.dot_dimension_numbers<[1], [0], [0], [1], [0, 0, 1, 1], [], []>} : vector<8x896xf32>, vector<896x256xf32>, vector<8x256xf32> -> vector<8x256xf32>
    %cst_3 = arith.constant 1.000000e+01 : f32
    %3 = vector.broadcast %cst_3 : f32 to vector<8x256xf32>
    %4 = arith.mulf %3, %2 : vector<8x256xf32>
    %cst_4 = arith.constant 2.000000e+01 : f32
    %5 = vector.broadcast %cst_4 : f32 to vector<8x256xf32>
    %6 = arith.minimumf %4, %5 : vector<8x256xf32>
    %7 = math.exp %6 : vector<8x256xf32>
    %8 = math.log1p %7 : vector<8x256xf32>
    %cst_5 = arith.constant 1.000000e-01 : f32
    %9 = vector.broadcast %cst_5 : f32 to vector<8x256xf32>
    %10 = arith.mulf %8, %9 : vector<8x256xf32>
    %cst_6 = arith.constant 2.000000e+01 : f32
    %11 = vector.broadcast %cst_6 : f32 to vector<8x256xf32>
    %12 = arith.cmpf ogt, %4, %11 : vector<8x256xf32>
    %13 = arith.select %12, %2, %10 : vector<8x256xi1>, vector<8x256xf32>
    %c0_7 = arith.constant 0 : index
    %c0_8 = arith.constant 0 : index
    %14 = vector.load %arg7[%c0_7, %c0_8] : memref<8x256xf32, #tpu.memory_space<vmem>>, vector<8x256xf32>
    tpu.vector_store %arg7[%c0_7, %c0_8], %13 {strides = array<i32>} : memref<8x256xf32, #tpu.memory_space<vmem>>, vector<8x256xf32>,
    %c0_9 = arith.constant 0 : index
    %c0_10 = arith.constant 0 : index
    %15 = vector.load %arg3[%c0_9, %c0_10] : memref<256x256xf32, #tpu.memory_space<vmem>>, vector<256x256xf32>
    %cst_11 = arith.constant dense<0.000000e+00> : vector<8x256xf32>
    %16 = tpu.matmul %13, %15, %cst_11 {dimension_numbers = #tpu.dot_dimension_numbers<[1], [0], [0], [1], [0, 0, 1, 1], [], []>} : vector<8x256xf32>, vector<256x256xf32>, vector<8x256xf32> -> vector<8x256xf32>
    %cst_12 = arith.constant 1.000000e+01 : f32
    %17 = vector.broadcast %cst_12 : f32 to vector<8x256xf32>
    %18 = arith.mulf %17, %16 : vector<8x256xf32>
    %cst_13 = arith.constant 2.000000e+01 : f32
    %19 = vector.broadcast %cst_13 : f32 to vector<8x256xf32>
    %20 = arith.minimumf %18, %19 : vector<8x256xf32>
    %21 = math.exp %20 : vector<8x256xf32>
    %22 = math.log1p %21 : vector<8x256xf32>
    %cst_14 = arith.constant 1.000000e-01 : f32
    %23 = vector.broadcast %cst_14 : f32 to vector<8x256xf32>
    %24 = arith.mulf %22, %23 : vector<8x256xf32>
    %cst_15 = arith.constant 2.000000e+01 : f32
    %25 = vector.broadcast %cst_15 : f32 to vector<8x256xf32>
    %26 = arith.cmpf ogt, %18, %25 : vector<8x256xf32>
    %27 = arith.select %26, %16, %24 : vector<8x256xi1>, vector<8x256xf32>
    %c0_16 = arith.constant 0 : index
    %c0_17 = arith.constant 0 : index
    %28 = vector.load %arg8[%c0_16, %c0_17] : memref<8x256xf32, #tpu.memory_space<vmem>>, vector<8x256xf32>
    tpu.vector_store %arg8[%c0_16, %c0_17], %27 {strides = array<i32>} : memref<8x256xf32, #tpu.memory_space<vmem>>, vector<8x256xf32>,
    %c0_18 = arith.constant 0 : index
    %c0_19 = arith.constant 0 : index
    %29 = vector.load %arg4[%c0_18, %c0_19] : memref<256x128xf32, #tpu.memory_space<vmem>>, vector<256x128xf32>
    %cst_20 = arith.constant dense<0.000000e+00> : vector<8x128xf32>
    %30 = tpu.matmul %27, %29, %cst_20 {dimension_numbers = #tpu.dot_dimension_numbers<[1], [0], [0], [1], [0, 0, 1, 1], [], []>} : vector<8x256xf32>, vector<256x128xf32>, vector<8x128xf32> -> vector<8x128xf32>
    %cst_21 = arith.constant 1.000000e+01 : f32
    %31 = vector.broadcast %cst_21 : f32 to vector<8x128xf32>
    %32 = arith.mulf %31, %30 : vector<8x128xf32>
    %cst_22 = arith.constant 2.000000e+01 : f32
    %33 = vector.broadcast %cst_22 : f32 to vector<8x128xf32>
    %34 = arith.minimumf %32, %33 : vector<8x128xf32>
    %35 = math.exp %34 : vector<8x128xf32>
    %36 = math.log1p %35 : vector<8x128xf32>
    %cst_23 = arith.constant 1.000000e-01 : f32
    %37 = vector.broadcast %cst_23 : f32 to vector<8x128xf32>
    %38 = arith.mulf %36, %37 : vector<8x128xf32>
    %cst_24 = arith.constant 2.000000e+01 : f32
    %39 = vector.broadcast %cst_24 : f32 to vector<8x128xf32>
    %40 = arith.cmpf ogt, %32, %39 : vector<8x128xf32>
    %41 = arith.select %40, %30, %38 : vector<8x128xi1>, vector<8x128xf32>
    %c0_25 = arith.constant 0 : index
    %c0_26 = arith.constant 0 : index
    %42 = vector.load %arg9[%c0_25, %c0_26] : memref<8x128xf32, #tpu.memory_space<vmem>>, vector<8x128xf32>
    tpu.vector_store %arg9[%c0_25, %c0_26], %41 {strides = array<i32>} : memref<8x128xf32, #tpu.memory_space<vmem>>, vector<8x128xf32>,
    %c0_27 = arith.constant 0 : index
    %c0_28 = arith.constant 0 : index
    %43 = vector.load %arg5[%c0_27, %c0_28] : memref<128x128xf32, #tpu.memory_space<vmem>>, vector<128x128xf32>
    %cst_29 = arith.constant dense<0.000000e+00> : vector<8x128xf32>
    %44 = tpu.matmul %41, %43, %cst_29 {dimension_numbers = #tpu.dot_dimension_numbers<[1], [0], [0], [1], [0, 0, 1, 1], [], []>} : vector<8x128xf32>, vector<128x128xf32>, vector<8x128xf32> -> vector<8x128xf32>
    %cst_30 = arith.constant 1.000000e+01 : f32
    %45 = vector.broadcast %cst_30 : f32 to vector<8x128xf32>
    %46 = arith.mulf %45, %44 : vector<8x128xf32>
    %cst_31 = arith.constant 2.000000e+01 : f32
    %47 = vector.broadcast %cst_31 : f32 to vector<8x128xf32>
    %48 = arith.minimumf %46, %47 : vector<8x128xf32>
    %49 = math.exp %48 : vector<8x128xf32>
    %50 = math.log1p %49 : vector<8x128xf32>
    %cst_32 = arith.constant 1.000000e-01 : f32
    %51 = vector.broadcast %cst_32 : f32 to vector<8x128xf32>
    %52 = arith.mulf %50, %51 : vector<8x128xf32>
    %cst_33 = arith.constant 2.000000e+01 : f32
    %53 = vector.broadcast %cst_33 : f32 to vector<8x128xf32>
    %54 = arith.cmpf ogt, %46, %53 : vector<8x128xf32>
    %55 = arith.select %54, %44, %52 : vector<8x128xi1>, vector<8x128xf32>
    %c0_34 = arith.constant 0 : index
    %c0_35 = arith.constant 0 : index
    %56 = vector.load %arg10[%c0_34, %c0_35] : memref<8x128xf32, #tpu.memory_space<vmem>>, vector<8x128xf32>
    tpu.vector_store %arg10[%c0_34, %c0_35], %55 {strides = array<i32>} : memref<8x128xf32, #tpu.memory_space<vmem>>, vector<8x128xf32>,
    %c0_36 = arith.constant 0 : index
    %c0_37 = arith.constant 0 : index
    %57 = vector.load %arg6[%c0_36, %c0_37] : memref<128x128xf32, #tpu.memory_space<vmem>>, vector<128x128xf32>
    %cst_38 = arith.constant dense<0.000000e+00> : vector<8x128xf32>
    %58 = tpu.matmul %55, %57, %cst_38 {dimension_numbers = #tpu.dot_dimension_numbers<[1], [0], [0], [1], [0, 0, 1, 1], [], []>} : vector<8x128xf32>, vector<128x128xf32>, vector<8x128xf32> -> vector<8x128xf32>
    %c0_39 = arith.constant 0 : index
    %c0_40 = arith.constant 0 : index
    %59 = vector.load %arg11[%c0_39, %c0_40] : memref<8x128xf32, #tpu.memory_space<vmem>>, vector<8x128xf32>
    tpu.vector_store %arg11[%c0_39, %c0_40], %58 {strides = array<i32>} : memref<8x128xf32, #tpu.memory_space<vmem>>, vector<8x128xf32>,
    return
  }
  func.func @transform_0(%arg0: i32) -> (i32, i32) {
    %c0_i32 = arith.constant 0 : i32
    %c0_i32_0 = arith.constant 0 : i32
    return %arg0, %c0_i32 : i32, i32
  }
  func.func @transform_1(%arg0: i32) -> (i32, i32) {
    %c0_i32 = arith.constant 0 : i32
    %c0_i32_0 = arith.constant 0 : i32
    %c0_i32_1 = arith.constant 0 : i32
    return %c0_i32, %c0_i32_0 : i32, i32
  }
  func.func @transform_2(%arg0: i32) -> (i32, i32) {
    %c0_i32 = arith.constant 0 : i32
    %c0_i32_0 = arith.constant 0 : i32
    %c0_i32_1 = arith.constant 0 : i32
    return %c0_i32, %c0_i32_0 : i32, i32
  }
  func.func @transform_3(%arg0: i32) -> (i32, i32) {
    %c0_i32 = arith.constant 0 : i32
    %c0_i32_0 = arith.constant 0 : i32
    %c0_i32_1 = arith.constant 0 : i32
    return %c0_i32, %c0_i32_0 : i32, i32
  }
  func.func @transform_4(%arg0: i32) -> (i32, i32) {
    %c0_i32 = arith.constant 0 : i32
    %c0_i32_0 = arith.constant 0 : i32
    %c0_i32_1 = arith.constant 0 : i32
    return %c0_i32, %c0_i32_0 : i32, i32
  }
  func.func @transform_5(%arg0: i32) -> (i32, i32) {
    %c0_i32 = arith.constant 0 : i32
    %c0_i32_0 = arith.constant 0 : i32
    %c0_i32_1 = arith.constant 0 : i32
    return %c0_i32, %c0_i32_0 : i32, i32
  }
  func.func @transform_6(%arg0: i32) -> (i32, i32) {
    %c0_i32 = arith.constant 0 : i32
    %c0_i32_0 = arith.constant 0 : i32
    return %arg0, %c0_i32 : i32, i32
  }
  func.func @transform_7(%arg0: i32) -> (i32, i32) {
    %c0_i32 = arith.constant 0 : i32
    %c0_i32_0 = arith.constant 0 : i32
    return %arg0, %c0_i32 : i32, i32
  }
  func.func @transform_8(%arg0: i32) -> (i32, i32) {
    %c0_i32 = arith.constant 0 : i32
    %c0_i32_0 = arith.constant 0 : i32
    return %arg0, %c0_i32 : i32, i32
  }
  func.func @transform_9(%arg0: i32) -> (i32, i32) {
    %c0_i32 = arith.constant 0 : i32
    %c0_i32_0 = arith.constant 0 : i32
    return %arg0, %c0_i32 : i32, i32
  }
  func.func @transform_10(%arg0: i32) -> (i32, i32) {
    %c0_i32 = arith.constant 0 : i32
    %c0_i32_0 = arith.constant 0 : i32
    return %arg0, %c0_i32 : i32, i32
  }
}

</mosaic_0001>

<bundles_post_ra>
// kernel: chemical_nn_forward_padded.1
= control target key start
LH: loop header
LB: loop body
LE: loop exit
PB: predicated region body
PF: predicated region fallthrough
CT: control target
= control target key end

     0   :  { %16 = vsyncpa [#allocation3], 0  ;;  %s3008_s0 = inlined_call_operand.vmem [shape: f32[8,896], index: 0, kind: input, shape index: {}]   ;;  %s3009_s1 = inlined_call_operand.vmem [shape: f32[896,256], index: 1, kind: input, shape index: {}]   ;;  %s3010_s2 = inlined_call_operand.vmem [shape: f32[256,256], index: 2, kind: input, shape index: {}]   ;;  %s3011_s3 = inlined_call_operand.vmem [shape: f32[256,128], index: 3, kind: input, shape index: {}]   ;;  %s3012_s4 = inlined_call_operand.vmem [shape: f32[128,128], index: 4, kind: input, shape index: {}]   ;;  %s3013_s5 = inlined_call_operand.vmem [shape: f32[128,128], index: 5, kind: input, shape index: {}]   ;;  %s3014_s6 = inlined_call_operand.hbm [shape: f32[8,256], index: 6, kind: output, shape index: {0}]   ;;  %s3015_s7 = inlined_call_operand.hbm [shape: f32[8,256], index: 7, kind: output, shape index: {1}]   ;;  %s3016_s8 = inlined_call_operand.hbm [shape: f32[8,128], index: 8, kind: output, shape index: {2}]   ;;  %s3017_s9 = inlined_call_operand.hbm [shape: f32[8,128], index: 9, kind: output, shape index: {3}]   ;;  %s3018_s10 = inlined_call_operand.hbm [shape: f32[8,128], index: 10, kind: output, shape index: {4}]  }
   0x1   :  { %17 = vsyncpa [#allocation5], 0  ;;  %v39_v0 = vld [vmem:[%s3009_s1 + $0x8] sm:$0xff]  ;;  %v41_v1 = vld [vmem:[%s3009_s1 + $0x18] sm:$0xff] }
   0x2   :  { %v38_v2 = vld [vmem:[%s3009_s1] sm:$0xff]  ;;  %v1265_v3 = vpack.c.bf16 %v41_v1, %v39_v0  ;;  %v40_v4 = vld [vmem:[%s3009_s1 + $0x10] sm:$0xff]  ;;  %v43_v5 = vld [vmem:[%s3009_s1 + $0x28] sm:$0xff] }
   0x3   :  { %v45_v6 = vld [vmem:[%s3009_s1 + $0x38] sm:$0xff]  ;;  %v1267_v7 = vpack.c.bf16 %v40_v4, %v38_v2  ;;  %v42_v9 = vld [vmem:[%s3009_s1 + $0x20] sm:$0xff]  ;;  %v44_v10 = vld [vmem:[%s3009_s1 + $0x30] sm:$0xff] }
   0x4   :  { %v1269_v8 = vpack.c.bf16 %v45_v6, %v43_v5  ;;  %v47_v11 = vld [vmem:[%s3009_s1 + $0x48] sm:$0xff]  ;;  %1266 = vmatprep.subr.bf16.mxu0 %v1265_v3  ;;  %v49_v12 = vld [vmem:[%s3009_s1 + $0x58] sm:$0xff]  ;;  %v1271_v13 = vpack.c.bf16 %v44_v10, %v42_v9  ;;  %v46_v15 = vld [vmem:[%s3009_s1 + $0x40] sm:$0xff] }
   0x5   :  { %1268 = vmatpush1.bf16.msra.mxu0 %v1267_v7  ;;  %v1273_v14 = vpack.c.bf16 %v49_v12, %v47_v11  ;;  %v48_v16 = vld [vmem:[%s3009_s1 + $0x50] sm:$0xff]  ;;  %v51_v17 = vld [vmem:[%s3009_s1 + $0x68] sm:$0xff]  ;;  %v53_v18 = vld [vmem:[%s3009_s1 + $0x78] sm:$0xff] }
   0x6   :  { %1270 = vmatprep.subr.bf16.mxu0 %v1269_v8  ;;  %v1275_v19 = vpack.c.bf16 %v48_v16, %v46_v15  ;;  %v1277_v20 = vpack.c.bf16 %v53_v18, %v51_v17  ;;  %v50_v21 = vld [vmem:[%s3009_s1 + $0x60] sm:$0xff]  ;;  %v52_v22 = vld [vmem:[%s3009_s1 + $0x70] sm:$0xff]  ;;  %v55_v23 = vld [vmem:[%s3009_s1 + $0x88] sm:$0xff] }
   0x7   :  { %v57_v24 = vld [vmem:[%s3009_s1 + $0x98] sm:$0xff]  ;;  %v1279_v25 = vpack.c.bf16 %v52_v22, %v50_v21  ;;  %v54_v27 = vld [vmem:[%s3009_s1 + $0x80] sm:$0xff]  ;;  %v56_v28 = vld [vmem:[%s3009_s1 + $0x90] sm:$0xff] }
   0x8   :  { %v1281_v26 = vpack.c.bf16 %v57_v24, %v55_v23  ;;  %v59_v29 = vld [vmem:[%s3009_s1 + $0xa8] sm:$0xff]  ;;  %v61_v30 = vld [vmem:[%s3009_s1 + $0xb8] sm:$0xff]  ;;  %v1283_v31 = vpack.c.bf16 %v56_v28, %v54_v27  ;;  %v58_v33 = vld [vmem:[%s3009_s1 + $0xa0] sm:$0xff] }
   0x9   :  { %1272 = vmatpush1.bf16.msra.mxu0 %v1271_v13  ;;  %v1285_v32 = vpack.c.bf16 %v61_v30, %v59_v29  ;;  %v60_v34 = vld [vmem:[%s3009_s1 + $0xb0] sm:$0xff]  ;;  %v63_v35 = vld [vmem:[%s3009_s1 + $0xc8] sm:$0xff]  ;;  %v65_v36 = vld [vmem:[%s3009_s1 + $0xd8] sm:$0xff] }
   0xa   :  { %1274 = vmatprep.subr.bf16.mxu0 %v1273_v14  ;;  %v1287_v37 = vpack.c.bf16 %v60_v34, %v58_v33  ;;  %v1289_v38 = vpack.c.bf16 %v65_v36, %v63_v35  ;;  %v62_v39 = vld [vmem:[%s3009_s1 + $0xc0] sm:$0xff]  ;;  %v64_v40 = vld [vmem:[%s3009_s1 + $0xd0] sm:$0xff]  ;;  %v32_v41 = vld [vmem:[%s3008_s0 + $0x8] sm:$0xff] }
   0xb   :  { %v67_v42 = vld [vmem:[%s3009_s1 + $0xe8] sm:$0xff]  ;;  %v69_v43 = vld [vmem:[%s3009_s1 + $0xf8] sm:$0xff]  ;;  %326 = vmatprep.mubr.f32.mxu0 %v32_v41  ;;  %v1291_v44 = vpack.c.bf16 %v64_v40, %v62_v39  ;;  %v66_v46 = vld [vmem:[%s3009_s1 + $0xe0] sm:$0xff] }
   0xc   :  { %v1293_v45 = vpack.c.bf16 %v69_v43, %v67_v42  ;;  %v68_v47 = vld [vmem:[%s3009_s1 + $0xf0] sm:$0xff]  ;;  %v71_v48 = vld [vmem:[%s3009_s1 + $0x108] sm:$0xff]  ;;  %v73_v49 = vld [vmem:[%s3009_s1 + $0x118] sm:$0xff] }
   0xd   :  { %1276 = vmatpush1.bf16.msra.mxu0 %v1275_v19  ;;  %v1295_v50 = vpack.c.bf16 %v68_v47, %v66_v46  ;;  %v1297_v51 = vpack.c.bf16 %v73_v49, %v71_v48  ;;  %v70_v52 = vld [vmem:[%s3009_s1 + $0x100] sm:$0xff]  ;;  %v72_v53 = vld [vmem:[%s3009_s1 + $0x110] sm:$0xff]  ;;  %v75_v54 = vld [vmem:[%s3009_s1 + $0x128] sm:$0xff] }
   0xe   :  { %1278 = vmatprep.subr.bf16.mxu0 %v1277_v20  ;;  %v77_v55 = vld [vmem:[%s3009_s1 + $0x138] sm:$0xff]  ;;  %v1299_v56 = vpack.c.bf16 %v72_v53, %v70_v52  ;;  %v74_v58 = vld [vmem:[%s3009_s1 + $0x120] sm:$0xff]  ;;  %v76_v59 = vld [vmem:[%s3009_s1 + $0x130] sm:$0xff] }
   0xf   :  { %v1301_v57 = vpack.c.bf16 %v77_v55, %v75_v54  ;;  %v79_v60 = vld [vmem:[%s3009_s1 + $0x148] sm:$0xff]  ;;  %v81_v61 = vld [vmem:[%s3009_s1 + $0x158] sm:$0xff]  ;;  %v1303_v62 = vpack.c.bf16 %v76_v59, %v74_v58  ;;  %v78_v0 = vld [vmem:[%s3009_s1 + $0x140] sm:$0xff] }
  0x10   :  { %v1305_v63 = vpack.c.bf16 %v81_v61, %v79_v60  ;;  %v80_v1 = vld [vmem:[%s3009_s1 + $0x150] sm:$0xff]  ;;  %v83_v2 = vld [vmem:[%s3009_s1 + $0x168] sm:$0xff]  ;;  %v85_v3 = vld [vmem:[%s3009_s1 + $0x178] sm:$0xff] }
  0x11   :  { %1280 = vmatpush1.bf16.msra.mxu0 %v1279_v25  ;;  %v1307_v4 = vpack.c.bf16 %v80_v1, %v78_v0  ;;  %v1309_v5 = vpack.c.bf16 %v85_v3, %v83_v2  ;;  %v82_v6 = vld [vmem:[%s3009_s1 + $0x160] sm:$0xff]  ;;  %v84_v7 = vld [vmem:[%s3009_s1 + $0x170] sm:$0xff]  ;;  %v87_v8 = vld [vmem:[%s3009_s1 + $0x188] sm:$0xff] }
  0x12   :  { %1282 = vmatprep.subr.bf16.mxu0 %v1281_v26  ;;  %v89_v9 = vld [vmem:[%s3009_s1 + $0x198] sm:$0xff]  ;;  %v1311_v10 = vpack.c.bf16 %v84_v7, %v82_v6  ;;  %v86_v12 = vld [vmem:[%s3009_s1 + $0x180] sm:$0xff]  ;;  %v88_v13 = vld [vmem:[%s3009_s1 + $0x190] sm:$0xff]  ;;  %v1787_v7 = vmov 0.0  }
  0x13   :  { %v1313_v11 = vpack.c.bf16 %v89_v9, %v87_v8  ;;  %v91_v14 = vld [vmem:[%s3009_s1 + $0x1a8] sm:$0xff]  ;;  %v93_v15 = vld [vmem:[%s3009_s1 + $0x1b8] sm:$0xff]  ;;  %v1315_v16 = vpack.c.bf16 %v88_v13, %v86_v12  ;;  %v90_v18 = vld [vmem:[%s3009_s1 + $0x1a0] sm:$0xff]  ;;  %539 = vmatprep.mubr.f32.mxu1 %v1787_v7 }
  0x14   :  { %v1317_v17 = vpack.c.bf16 %v93_v15, %v91_v14  ;;  %v92_v19 = vld [vmem:[%s3009_s1 + $0x1b0] sm:$0xff]  ;;  %v95_v20 = vld [vmem:[%s3009_s1 + $0x1c8] sm:$0xff]  ;;  %v97_v21 = vld [vmem:[%s3009_s1 + $0x1d8] sm:$0xff] }
  0x15   :  { %1284 = vmatpush1.bf16.msra.mxu0 %v1283_v31  ;;  %v1319_v22 = vpack.c.bf16 %v92_v19, %v90_v18  ;;  %v1321_v23 = vpack.c.bf16 %v97_v21, %v95_v20  ;;  %v94_v24 = vld [vmem:[%s3009_s1 + $0x1c0] sm:$0xff]  ;;  %v96_v25 = vld [vmem:[%s3009_s1 + $0x1d0] sm:$0xff]  ;;  %v99_v26 = vld [vmem:[%s3009_s1 + $0x1e8] sm:$0xff] }
  0x16   :  { %1286 = vmatprep.subr.bf16.mxu0 %v1285_v32  ;;  %v101_v27 = vld [vmem:[%s3009_s1 + $0x1f8] sm:$0xff]  ;;  %v231_v28 = vld [vmem:[%s3009_s1 + $0x608] sm:$0xff]  ;;  %v1323_v30 = vpack.c.bf16 %v96_v25, %v94_v24  ;;  %v98_v31 = vld [vmem:[%s3009_s1 + $0x1e0] sm:$0xff] }
  0x17   :  { %v233_v29 = vld [vmem:[%s3009_s1 + $0x618] sm:$0xff]  ;;  %v230_v33 = vld [vmem:[%s3009_s1 + $0x600] sm:$0xff]  ;;  %v232_v34 = vld [vmem:[%s3009_s1 + $0x610] sm:$0xff]  ;;  %v1325_v35 = vpack.c.bf16 %v101_v27, %v99_v26 }
  0x18   :  { %v1457_v32 = vpack.c.bf16 %v233_v29, %v231_v28  ;;  %v100_v36 = vld [vmem:[%s3009_s1 + $0x1f0] sm:$0xff]  ;;  %v237_v39 = vld [vmem:[%s3009_s1 + $0x638] sm:$0xff]  ;;  %v103_v40 = vld [vmem:[%s3009_s1 + $0x208] sm:$0xff] }
  0x19   :  { %1288 = vmatpush1.bf16.msra.mxu0 %v1287_v37  ;;  %v1459_v37 = vpack.c.bf16 %v232_v34, %v230_v33  ;;  %v105_v41 = vld [vmem:[%s3009_s1 + $0x218] sm:$0xff]  ;;  %v234_v43 = vld [vmem:[%s3009_s1 + $0x620] sm:$0xff]  ;;  %v239_v48 = vld [vmem:[%s3009_s1 + $0x648] sm:$0xff] }
  0x1a   :  { %1290 = vmatprep.subr.bf16.mxu0 %v1289_v38  ;;  %v235_v38 = vld [vmem:[%s3009_s1 + $0x628] sm:$0xff]  ;;  %1458 = vmatprep.subr.bf16.mxu1 %v1457_v32  ;;  %v102_v46 = vld [vmem:[%s3009_s1 + $0x200] sm:$0xff]  ;;  %v241_v49 = vld [vmem:[%s3009_s1 + $0x658] sm:$0xff] }
  0x1b   :  { %v1461_v42 = vpack.c.bf16 %v237_v39, %v235_v38  ;;  %1460 = vmatpush1.bf16.msra.mxu1 %v1459_v37  ;;  %v1465_v52 = vpack.c.bf16 %v241_v49, %v239_v48  ;;  %v238_v53 = vld [vmem:[%s3009_s1 + $0x640] sm:$0xff]  ;;  %v240_v54 = vld [vmem:[%s3009_s1 + $0x650] sm:$0xff]  ;;  %v107_v55 = vld [vmem:[%s3009_s1 + $0x228] sm:$0xff] }
  0x1c   :  { %v31_v58 = vld [vmem:[%s3008_s0] sm:$0xff]  ;;  %v1467_v60 = vpack.c.bf16 %v240_v54, %v238_v53  ;;  %v245_v61 = vld [vmem:[%s3009_s1 + $0x678] sm:$0xff]  ;;  %v244_v1 = vld [vmem:[%s3009_s1 + $0x670] sm:$0xff] }
  0x1d   :  { %1292 = vmatpush1.bf16.msra.mxu0 %v1291_v44  ;;  %v236_v44 = vld [vmem:[%s3009_s1 + $0x630] sm:$0xff]  ;;  %1462 = vmatprep.subr.bf16.mxu1 %v1461_v42  ;;  %v106_v59 = vld [vmem:[%s3009_s1 + $0x220] sm:$0xff]  ;;  %v34_v3 = vld [vmem:[%s3008_s0 + $0x18] sm:$0xff] }
  0x1e   :  { %1294 = vmatprep.subr.bf16.mxu0 %v1293_v45  ;;  %v1327_v45 = vpack.c.bf16 %v100_v36, %v98_v31  ;;  %v1463_v47 = vpack.c.bf16 %v236_v44, %v234_v43  ;;  %v242_v0 = vld [vmem:[%s3009_s1 + $0x660] sm:$0xff]  ;;  %v249_v6 = vld [vmem:[%s3009_s1 + $0x698] sm:$0xff]  ;;  %v111_v8 = vld [vmem:[%s3009_s1 + $0x248] sm:$0xff] }
  0x1f   :  { %v113_v9 = vld [vmem:[%s3009_s1 + $0x258] sm:$0xff]  ;;  %v110_v12 = vld [vmem:[%s3009_s1 + $0x240] sm:$0xff]  ;;  %v248_v15 = vld [vmem:[%s3009_s1 + $0x690] sm:$0xff] }
  0x20   :  { %1464 = vmatpush1.bf16.msra.mxu1 %v1463_v47  ;;  %v246_v14 = vld [vmem:[%s3009_s1 + $0x680] sm:$0xff]  ;;  %v251_v18 = vld [vmem:[%s3009_s1 + $0x6a8] sm:$0xff]  ;;  %v253_v19 = vld [vmem:[%s3009_s1 + $0x6b8] sm:$0xff] }
  0x21   :  { %1296 = vmatpush1.bf16.msra.mxu0 %v1295_v50  ;;  %v1329_v50 = vpack.c.bf16 %v105_v41, %v103_v40  ;;  %1466 = vmatprep.subr.bf16.mxu1 %v1465_v52  ;;  %v115_v20 = vld [vmem:[%s3009_s1 + $0x268] sm:$0xff]  ;;  %v117_v21 = vld [vmem:[%s3009_s1 + $0x278] sm:$0xff]  ;;  %v114_v24 = vld [vmem:[%s3009_s1 + $0x260] sm:$0xff]  ;;  %v1477_v25 = vpack.c.bf16 %v253_v19, %v251_v18 }
  0x22   :  { %1298 = vmatprep.subr.bf16.mxu0 %v1297_v51  ;;  %v104_v51 = vld [vmem:[%s3009_s1 + $0x210] sm:$0xff]  ;;  %v250_v26 = vld [vmem:[%s3009_s1 + $0x6a0] sm:$0xff]  ;;  %v1341_v28 = vpack.c.bf16 %v117_v21, %v115_v20  ;;  %v257_v31 = vld [vmem:[%s3009_s1 + $0x6d8] sm:$0xff] }
  0x23   :  { %v252_v27 = vld [vmem:[%s3009_s1 + $0x6b0] sm:$0xff]  ;;  %v119_v32 = vld [vmem:[%s3009_s1 + $0x288] sm:$0xff]  ;;  %v121_v33 = vld [vmem:[%s3009_s1 + $0x298] sm:$0xff] }
  0x24   :  { %1468 = vmatpush1.bf16.msra.mxu1 %v1467_v60  ;;  %v116_v29 = vld [vmem:[%s3009_s1 + $0x270] sm:$0xff]  ;;  %v1479_v34 = vpack.c.bf16 %v252_v27, %v250_v26  ;;  %v118_v36 = vld [vmem:[%s3009_s1 + $0x280] sm:$0xff]  ;;  %v1345_v40 = vpack.c.bf16 %v121_v33, %v119_v32  ;;  %v259_v42 = vld [vmem:[%s3009_s1 + $0x6e8] sm:$0xff] }
  0x25   :  { %1300 = vmatpush1.bf16.msra.mxu0 %v1299_v56  ;;  %v109_v56 = vld [vmem:[%s3009_s1 + $0x238] sm:$0xff]  ;;  %v254_v38 = vld [vmem:[%s3009_s1 + $0x6c0] sm:$0xff]  ;;  %v256_v39 = vld [vmem:[%s3009_s1 + $0x6d0] sm:$0xff] }
  0x26   :  { %1302 = vmatprep.subr.bf16.mxu0 %v1301_v57  ;;  %v243_v57 = vld [vmem:[%s3009_s1 + $0x668] sm:$0xff]  ;;  %v1333_v2 = vpack.c.bf16 %v109_v56, %v107_v55  ;;  %v120_v41 = vld [vmem:[%s3009_s1 + $0x290] sm:$0xff]  ;;  %v261_v43 = vld [vmem:[%s3009_s1 + $0x6f8] sm:$0xff] }
  0x27   :  { %v123_v44 = vld [vmem:[%s3009_s1 + $0x2a8] sm:$0xff]  ;;  %v1347_v47 = vpack.c.bf16 %v120_v41, %v118_v36  ;;  %v122_v48 = vld [vmem:[%s3009_s1 + $0x2a0] sm:$0xff]  ;;  %v1485_v49 = vpack.c.bf16 %v261_v43, %v259_v42  ;;  %v124_v53 = vld [vmem:[%s3009_s1 + $0x2b0] sm:$0xff] }
  0x28   :  { %v581_v54 = vld [vmem:[%s3010_s2 + $0x8] sm:$0xff]  ;;  %v583_v55 = vld [vmem:[%s3010_s2 + $0x18] sm:$0xff]  ;;  %v1351_v60 = vpack.c.bf16 %v124_v53, %v122_v48 }
  0x29   :  { %1304 = vmatpush1.bf16.msra.mxu0 %v1303_v62  ;;  %v1331_v62 = vpack.c.bf16 %v104_v51, %v102_v46  ;;  %v1483_v46 = vpack.c.bf16 %v256_v39, %v254_v38  ;;  %v260_v51 = vld [vmem:[%s3009_s1 + $0x6f0] sm:$0xff]  ;;  %v127_v56 = vld [vmem:[%s3009_s1 + $0x2c8] sm:$0xff] }
  0x2a   :  { %1306 = vmatprep.subr.bf16.mxu0 %v1305_v63  ;;  %v108_v63 = vld [vmem:[%s3009_s1 + $0x230] sm:$0xff] }
  0x2d   :  { %1308 = vmatpush1.bf16.msra.mxu0 %v1307_v4  ;;  %v1469_v4 = vpack.c.bf16 %v245_v61, %v243_v57  ;;  %v129_v57 = vld [vmem:[%s3009_s1 + $0x2d8] sm:$0xff]  ;;  %v128_v61 = vld [vmem:[%s3009_s1 + $0x2d0] sm:$0xff] }
  0x2e   :  { %1310 = vmatprep.subr.bf16.mxu0 %v1309_v5  ;;  %v247_v5 = vld [vmem:[%s3009_s1 + $0x688] sm:$0xff] }
  0x2f   :  { %v1473_v13 = vpack.c.bf16 %v249_v6, %v247_v5  ;;  %1470 = vmatprep.subr.bf16.mxu1 %v1469_v4 }
  0x31   :  { %1312 = vmatpush1.bf16.msra.mxu0 %v1311_v10  ;;  %v1471_v10 = vpack.c.bf16 %v244_v1, %v242_v0  ;;  %v582_v0 = vld [vmem:[%s3010_s2 + $0x10] sm:$0xff]  ;;  %v1353_v1 = vpack.c.bf16 %v129_v57, %v127_v56 }
  0x32   :  { %1314 = vmatprep.subr.bf16.mxu0 %v1313_v11  ;;  %v1335_v11 = vpack.c.bf16 %v108_v63, %v106_v59  ;;  %v580_v63 = vld [vmem:[%s3010_s2] sm:$0xff] }
  0x33   :  { %1472 = vmatpush1.bf16.msra.mxu1 %v1471_v10 }
  0x34   :  { %1474 = vmatprep.subr.bf16.mxu1 %v1473_v13 }
  0x35   :  { %1316 = vmatpush1.bf16.msra.mxu0 %v1315_v16  ;;  %v1337_v16 = vpack.c.bf16 %v113_v9, %v111_v8 }
  0x36   :  { %1318 = vmatprep.subr.bf16.mxu0 %v1317_v17  ;;  %v112_v17 = vld [vmem:[%s3009_s1 + $0x250] sm:$0xff] }
  0x39   :  { %1320 = vmatpush1.bf16.msra.mxu0 %v1319_v22  ;;  %v1475_v22 = vpack.c.bf16 %v248_v15, %v246_v14 }
  0x3a   :  { %1322 = vmatprep.subr.bf16.mxu0 %v1321_v23  ;;  %v1339_v23 = vpack.c.bf16 %v112_v17, %v110_v12 }
  0x3b   :  { %1476 = vmatpush1.bf16.msra.mxu1 %v1475_v22 }
  0x3c   :  { %1478 = vmatprep.subr.bf16.mxu1 %v1477_v25 }
  0x3d   :  { %1324 = vmatpush1.bf16.msra.mxu0 %v1323_v30  ;;  %v255_v30 = vld [vmem:[%s3009_s1 + $0x6c8] sm:$0xff] }
  0x3e   :  { %1326 = vmatprep.subr.bf16.mxu0 %v1325_v35  ;;  %v1343_v35 = vpack.c.bf16 %v116_v29, %v114_v24  ;;  %v1481_v37 = vpack.c.bf16 %v257_v31, %v255_v30 }
  0x3f   :  { %1480 = vmatpush1.bf16.msra.mxu1 %v1479_v34 }
  0x40   :  { %1482 = vmatprep.subr.bf16.mxu1 %v1481_v37 }
  0x41   :  { %1328 = vmatpush1.bf16.msra.mxu0 %v1327_v45  ;;  %v125_v45 = vld [vmem:[%s3009_s1 + $0x2b8] sm:$0xff] }
  0x42   :  { %1330 = vmatprep.subr.bf16.mxu0 %v1329_v50  ;;  %v258_v50 = vld [vmem:[%s3009_s1 + $0x6e0] sm:$0xff]  ;;  %v1349_v52 = vpack.c.bf16 %v125_v45, %v123_v44 }
  0x43   :  { %1484 = vmatpush1.bf16.msra.mxu1 %v1483_v46  ;;  %v1487_v59 = vpack.c.bf16 %v260_v51, %v258_v50 }
  0x44   :  { %327 = vmatmul.mubr.f32.vlgmr.msra.gmra.mrb[0].mxu0 %v31_v58  ;;  %v126_v58 = vld [vmem:[%s3009_s1 + $0x2c0] sm:$0xff]  ;;  %1486 = vmatprep.subr.bf16.mxu1 %v1485_v49 }
  0x45   :  { %1332 = vmatpush1.bf16.msra.mxu0 %v1331_v62  ;;  %397 = vmatprep.mubr.f32.mxu0 %v34_v3  ;;  %v1489_v62 = vpack.c.bf16 %v583_v55, %v581_v54  ;;  %v587_v3 = vld [vmem:[%s3010_s2 + $0x38] sm:$0xff] }
  0x46   :  { %1334 = vmatprep.subr.bf16.mxu0 %v1333_v2  ;;  %v585_v2 = vld [vmem:[%s3010_s2 + $0x28] sm:$0xff] }
  0x49   :  { %1336 = vmatpush1.bf16.msra.mxu0 %v1335_v11 }
  0x4a   :  { %1338 = vmatprep.subr.bf16.mxu0 %v1337_v16 }
  0x4d   :  { %1340 = vmatpush1.bf16.msra.mxu0 %v1339_v23 }
  0x4e   :  { %1342 = vmatprep.subr.bf16.mxu0 %v1341_v28 }
  0x51   :  { %1344 = vmatpush1.bf16.msra.mxu0 %v1343_v35 }
  0x52   :  { %1346 = vmatprep.subr.bf16.mxu0 %v1345_v40 }
  0x55   :  { %1348 = vmatpush1.bf16.msra.mxu0 %v1347_v47 }
  0x56   :  { %1350 = vmatprep.subr.bf16.mxu0 %v1349_v52 }
  0x57   :  { %18 = vsyncpa [#allocation8], 0  ;;  %v131_v4 = vld [vmem:[%s3009_s1 + $0x2e8] sm:$0xff]  ;;  %v133_v5 = vld [vmem:[%s3009_s1 + $0x2f8] sm:$0xff]  ;;  %1488 = vmatpush1.bf16.msra.mxu1 %v1487_v59  ;;  %v1491_v8 = vpack.c.bf16 %v582_v0, %v580_v63  ;;  %v1355_v9 = vpack.c.bf16 %v128_v61, %v126_v58  ;;  %v1493_v11 = vpack.c.bf16 %v587_v3, %v585_v2  ;;  %vm1789_vm8 = vmmov 0   ;;  %s1791_s23 = smov [#allocation7]  }
  0x58   :  { %v37_v6 = vld [vmem:[%s3008_s0 + $0x30] sm:$0xff]  ;;  %v130_v10 = vld [vmem:[%s3009_s1 + $0x2e0] sm:$0xff]  ;;  %1490 = vmatprep.subr.bf16.mxu1 %v1489_v62  ;;  %v1357_v14 = vpack.c.bf16 %v133_v5, %v131_v4  ;;  %v589_v16 = vld [vmem:[%s3010_s2 + $0x48] sm:$0xff]  ;;  %s1094_s24 = sshll.u32 %s1791_s23, 4  ;;  %s1095_s24 = int_to_ptr.vmem [resolvable:$true] %s1094_s24 }
  0x59   :  { %1352 = vmatpush1.bf16.msra.mxu0 %v1351_v60  ;;  %v584_v12 = vld [vmem:[%s3010_s2 + $0x20] sm:$0xff]  ;;  %v586_v13 = vld [vmem:[%s3010_s2 + $0x30] sm:$0xff]  ;;  %v591_v17 = vld [vmem:[%s3010_s2 + $0x58] sm:$0xff] }
  0x5a   :  { %1354 = vmatprep.subr.bf16.mxu0 %v1353_v1  ;;  %v132_v15 = vld [vmem:[%s3009_s1 + $0x2f0] sm:$0xff]  ;;  %v135_v18 = vld [vmem:[%s3009_s1 + $0x308] sm:$0xff]  ;;  %v137_v19 = vld [vmem:[%s3009_s1 + $0x318] sm:$0xff]  ;;  %540 = vmatmul.mubr.f32.vlgmr.msra.gmra.mrb[0].mxu1 %v37_v6  ;;  %v1495_v20 = vpack.c.bf16 %v586_v13, %v584_v12  ;;  %v1497_v23 = vpack.c.bf16 %v591_v17, %v589_v16 }
  0x5b   :  { %1492 = vmatpush1.bf16.msra.mxu1 %v1491_v8  ;;  %v1359_v21 = vpack.c.bf16 %v132_v15, %v130_v10  ;;  %v134_v22 = vld [vmem:[%s3009_s1 + $0x300] sm:$0xff]  ;;  %v590_v25 = vld [vmem:[%s3010_s2 + $0x50] sm:$0xff]  ;;  %v1361_v26 = vpack.c.bf16 %v137_v19, %v135_v18  ;;  %v593_v28 = vld [vmem:[%s3010_s2 + $0x68] sm:$0xff] }
  0x5c   :  { %1494 = vmatprep.subr.bf16.mxu1 %v1493_v11  ;;  %v588_v24 = vld [vmem:[%s3010_s2 + $0x40] sm:$0xff]  ;;  %v136_v27 = vld [vmem:[%s3009_s1 + $0x310] sm:$0xff]  ;;  %v595_v29 = vld [vmem:[%s3010_s2 + $0x78] sm:$0xff] }
  0x5d   :  { %1356 = vmatpush1.bf16.msra.mxu0 %v1355_v9  ;;  %v139_v30 = vld [vmem:[%s3009_s1 + $0x328] sm:$0xff]  ;;  %v141_v31 = vld [vmem:[%s3009_s1 + $0x338] sm:$0xff]  ;;  %v1499_v32 = vpack.c.bf16 %v590_v25, %v588_v24  ;;  %v1363_v33 = vpack.c.bf16 %v136_v27, %v134_v22  ;;  %v138_v34 = vld [vmem:[%s3009_s1 + $0x320] sm:$0xff]  ;;  %v1501_v35 = vpack.c.bf16 %v595_v29, %v593_v28 }
  0x5e   :  { %1358 = vmatprep.subr.bf16.mxu0 %v1357_v14  ;;  %v592_v36 = vld [vmem:[%s3010_s2 + $0x60] sm:$0xff]  ;;  %v594_v37 = vld [vmem:[%s3010_s2 + $0x70] sm:$0xff]  ;;  %v1365_v38 = vpack.c.bf16 %v141_v31, %v139_v30  ;;  %v597_v40 = vld [vmem:[%s3010_s2 + $0x88] sm:$0xff] }
  0x5f   :  { %1496 = vmatpush1.bf16.msra.mxu1 %v1495_v20  ;;  %v140_v39 = vld [vmem:[%s3009_s1 + $0x330] sm:$0xff]  ;;  %v599_v41 = vld [vmem:[%s3010_s2 + $0x98] sm:$0xff]  ;;  %v143_v42 = vld [vmem:[%s3009_s1 + $0x348] sm:$0xff]  ;;  %v1503_v44 = vpack.c.bf16 %v594_v37, %v592_v36 }
  0x60   :  { %1498 = vmatprep.subr.bf16.mxu1 %v1497_v23  ;;  %v145_v43 = vld [vmem:[%s3009_s1 + $0x358] sm:$0xff]  ;;  %v1367_v45 = vpack.c.bf16 %v140_v39, %v138_v34  ;;  %v142_v46 = vld [vmem:[%s3009_s1 + $0x340] sm:$0xff]  ;;  %v1505_v47 = vpack.c.bf16 %v599_v41, %v597_v40  ;;  %v598_v49 = vld [vmem:[%s3010_s2 + $0x90] sm:$0xff] }
  0x61   :  { %1360 = vmatpush1.bf16.msra.mxu0 %v1359_v21  ;;  %v596_v48 = vld [vmem:[%s3010_s2 + $0x80] sm:$0xff]  ;;  %v1369_v50 = vpack.c.bf16 %v145_v43, %v143_v42  ;;  %v144_v51 = vld [vmem:[%s3009_s1 + $0x350] sm:$0xff]  ;;  %v601_v52 = vld [vmem:[%s3010_s2 + $0xa8] sm:$0xff] }
  0x62   :  { %1362 = vmatprep.subr.bf16.mxu0 %v1361_v26  ;;  %v603_v53 = vld [vmem:[%s3010_s2 + $0xb8] sm:$0xff]  ;;  %v147_v54 = vld [vmem:[%s3009_s1 + $0x368] sm:$0xff]  ;;  %v1507_v56 = vpack.c.bf16 %v598_v49, %v596_v48  ;;  %v1371_v57 = vpack.c.bf16 %v144_v51, %v142_v46  ;;  %v600_v59 = vld [vmem:[%s3010_s2 + $0xa0] sm:$0xff] }
  0x63   :  { %1500 = vmatpush1.bf16.msra.mxu1 %v1499_v32  ;;  %v149_v55 = vld [vmem:[%s3009_s1 + $0x378] sm:$0xff]  ;;  %v1509_v58 = vpack.c.bf16 %v603_v53, %v601_v52  ;;  %v602_v60 = vld [vmem:[%s3010_s2 + $0xb0] sm:$0xff]  ;;  %v146_v62 = vld [vmem:[%s3009_s1 + $0x360] sm:$0xff] }
  0x64   :  { %1502 = vmatprep.subr.bf16.mxu1 %v1501_v35  ;;  %v1373_v61 = vpack.c.bf16 %v149_v55, %v147_v54  ;;  %v148_v63 = vld [vmem:[%s3009_s1 + $0x370] sm:$0xff]  ;;  %v151_v0 = vld [vmem:[%s3009_s1 + $0x388] sm:$0xff]  ;;  %v153_v1 = vld [vmem:[%s3009_s1 + $0x398] sm:$0xff]  ;;  %v1511_v2 = vpack.c.bf16 %v602_v60, %v600_v59 }
  0x65   :  { %1364 = vmatpush1.bf16.msra.mxu0 %v1363_v33  ;;  %v1375_v3 = vpack.c.bf16 %v148_v63, %v146_v62  ;;  %v1377_v4 = vpack.c.bf16 %v153_v1, %v151_v0  ;;  %v150_v5 = vld [vmem:[%s3009_s1 + $0x380] sm:$0xff]  ;;  %v152_v6 = vld [vmem:[%s3009_s1 + $0x390] sm:$0xff]  ;;  %v155_v8 = vld [vmem:[%s3009_s1 + $0x3a8] sm:$0xff] }
  0x66   :  { %1366 = vmatprep.subr.bf16.mxu0 %v1365_v38  ;;  %v157_v9 = vld [vmem:[%s3009_s1 + $0x3b8] sm:$0xff]  ;;  %v1379_v10 = vpack.c.bf16 %v152_v6, %v150_v5  ;;  %v154_v12 = vld [vmem:[%s3009_s1 + $0x3a0] sm:$0xff]  ;;  %v156_v13 = vld [vmem:[%s3009_s1 + $0x3b0] sm:$0xff] }
  0x67   :  { %1504 = vmatpush1.bf16.msra.mxu1 %v1503_v44  ;;  %v1381_v11 = vpack.c.bf16 %v157_v9, %v155_v8  ;;  %v159_v14 = vld [vmem:[%s3009_s1 + $0x3c8] sm:$0xff]  ;;  %v161_v15 = vld [vmem:[%s3009_s1 + $0x3d8] sm:$0xff]  ;;  %v1383_v16 = vpack.c.bf16 %v156_v13, %v154_v12  ;;  %v158_v18 = vld [vmem:[%s3009_s1 + $0x3c0] sm:$0xff] }
  0x68   :  { %1506 = vmatprep.subr.bf16.mxu1 %v1505_v47  ;;  %v1385_v17 = vpack.c.bf16 %v161_v15, %v159_v14  ;;  %v160_v19 = vld [vmem:[%s3009_s1 + $0x3d0] sm:$0xff]  ;;  %v163_v20 = vld [vmem:[%s3009_s1 + $0x3e8] sm:$0xff]  ;;  %v165_v21 = vld [vmem:[%s3009_s1 + $0x3f8] sm:$0xff] }
  0x69   :  { %1368 = vmatpush1.bf16.msra.mxu0 %v1367_v45  ;;  %v1387_v22 = vpack.c.bf16 %v160_v19, %v158_v18  ;;  %v1389_v23 = vpack.c.bf16 %v165_v21, %v163_v20  ;;  %v162_v24 = vld [vmem:[%s3009_s1 + $0x3e0] sm:$0xff]  ;;  %v164_v25 = vld [vmem:[%s3009_s1 + $0x3f0] sm:$0xff]  ;;  %v167_v26 = vld [vmem:[%s3009_s1 + $0x408] sm:$0xff] }
  0x6a   :  { %1370 = vmatprep.subr.bf16.mxu0 %v1369_v50  ;;  %v169_v27 = vld [vmem:[%s3009_s1 + $0x418] sm:$0xff]  ;;  %v1391_v28 = vpack.c.bf16 %v164_v25, %v162_v24  ;;  %v166_v30 = vld [vmem:[%s3009_s1 + $0x400] sm:$0xff]  ;;  %v168_v31 = vld [vmem:[%s3009_s1 + $0x410] sm:$0xff] }
  0x6b   :  { %1508 = vmatpush1.bf16.msra.mxu1 %v1507_v56  ;;  %v1393_v29 = vpack.c.bf16 %v169_v27, %v167_v26  ;;  %v171_v32 = vld [vmem:[%s3009_s1 + $0x428] sm:$0xff]  ;;  %v173_v33 = vld [vmem:[%s3009_s1 + $0x438] sm:$0xff]  ;;  %v33_v34 = vld [vmem:[%s3008_s0 + $0x10] sm:$0xff]  ;;  %v1395_v35 = vpack.c.bf16 %v168_v31, %v166_v30 }
  0x6c   :  { %1510 = vmatprep.subr.bf16.mxu1 %v1509_v58  ;;  %v1397_v36 = vpack.c.bf16 %v173_v33, %v171_v32  ;;  %v170_v37 = vld [vmem:[%s3009_s1 + $0x420] sm:$0xff]  ;;  %v172_v38 = vld [vmem:[%s3009_s1 + $0x430] sm:$0xff]  ;;  %v36_v39 = vld [vmem:[%s3008_s0 + $0x28] sm:$0xff] }
  0x6d   :  { %1372 = vmatpush1.bf16.msra.mxu0 %v1371_v57  ;;  %v175_v40 = vld [vmem:[%s3009_s1 + $0x448] sm:$0xff]  ;;  %v177_v41 = vld [vmem:[%s3009_s1 + $0x458] sm:$0xff]  ;;  %v1399_v42 = vpack.c.bf16 %v172_v38, %v170_v37  ;;  %v174_v44 = vld [vmem:[%s3009_s1 + $0x440] sm:$0xff] }
  0x6e   :  { %1374 = vmatprep.subr.bf16.mxu0 %v1373_v61  ;;  %v1401_v43 = vpack.c.bf16 %v177_v41, %v175_v40  ;;  %v176_v45 = vld [vmem:[%s3009_s1 + $0x450] sm:$0xff]  ;;  %v179_v46 = vld [vmem:[%s3009_s1 + $0x468] sm:$0xff]  ;;  %v181_v47 = vld [vmem:[%s3009_s1 + $0x478] sm:$0xff] }
  0x6f   :  { %1512 = vmatpush1.bf16.msra.mxu1 %v1511_v2  ;;  %v1403_v48 = vpack.c.bf16 %v176_v45, %v174_v44  ;;  %v1405_v49 = vpack.c.bf16 %v181_v47, %v179_v46  ;;  %v178_v50 = vld [vmem:[%s3009_s1 + $0x460] sm:$0xff]  ;;  %v180_v51 = vld [vmem:[%s3009_s1 + $0x470] sm:$0xff]  ;;  %v183_v52 = vld [vmem:[%s3009_s1 + $0x488] sm:$0xff] }
  0x70   :  { %v185_v53 = vld [vmem:[%s3009_s1 + $0x498] sm:$0xff]  ;;  %v1407_v54 = vpack.c.bf16 %v180_v51, %v178_v50  ;;  %v182_v56 = vld [vmem:[%s3009_s1 + $0x480] sm:$0xff]  ;;  %v184_v57 = vld [vmem:[%s3009_s1 + $0x490] sm:$0xff] }
  0x71   :  { %1376 = vmatpush1.bf16.msra.mxu0 %v1375_v3  ;;  %v1409_v55 = vpack.c.bf16 %v185_v53, %v183_v52  ;;  %v187_v58 = vld [vmem:[%s3009_s1 + $0x4a8] sm:$0xff]  ;;  %v189_v59 = vld [vmem:[%s3009_s1 + $0x4b8] sm:$0xff]  ;;  %v1411_v60 = vpack.c.bf16 %v184_v57, %v182_v56  ;;  %v186_v62 = vld [vmem:[%s3009_s1 + $0x4a0] sm:$0xff] }
  0x72   :  { %1378 = vmatprep.subr.bf16.mxu0 %v1377_v4  ;;  %v1413_v61 = vpack.c.bf16 %v189_v59, %v187_v58  ;;  %v188_v63 = vld [vmem:[%s3009_s1 + $0x4b0] sm:$0xff]  ;;  %v191_v0 = vld [vmem:[%s3009_s1 + $0x4c8] sm:$0xff]  ;;  %v193_v1 = vld [vmem:[%s3009_s1 + $0x4d8] sm:$0xff] }
  0x73   :  { %v1415_v2 = vpack.c.bf16 %v188_v63, %v186_v62  ;;  %v1417_v3 = vpack.c.bf16 %v193_v1, %v191_v0  ;;  %v190_v4 = vld [vmem:[%s3009_s1 + $0x4c0] sm:$0xff]  ;;  %v192_v5 = vld [vmem:[%s3009_s1 + $0x4d0] sm:$0xff]  ;;  %v195_v6 = vld [vmem:[%s3009_s1 + $0x4e8] sm:$0xff] }
  0x74   :  { %v197_v8 = vld [vmem:[%s3009_s1 + $0x4f8] sm:$0xff]  ;;  %v1419_v9 = vpack.c.bf16 %v192_v5, %v190_v4  ;;  %v196_v12 = vld [vmem:[%s3009_s1 + $0x4f0] sm:$0xff]  ;;  %v199_v13 = vld [vmem:[%s3009_s1 + $0x508] sm:$0xff] }
  0x75   :  { %1380 = vmatpush1.bf16.msra.mxu0 %v1379_v10  ;;  %v1421_v10 = vpack.c.bf16 %v197_v8, %v195_v6  ;;  %v201_v14 = vld [vmem:[%s3009_s1 + $0x518] sm:$0xff]  ;;  %v200_v18 = vld [vmem:[%s3009_s1 + $0x510] sm:$0xff]  ;;  %v203_v19 = vld [vmem:[%s3009_s1 + $0x528] sm:$0xff] }
  0x76   :  { %1382 = vmatprep.subr.bf16.mxu0 %v1381_v11  ;;  %v194_v11 = vld [vmem:[%s3009_s1 + $0x4e0] sm:$0xff]  ;;  %v205_v20 = vld [vmem:[%s3009_s1 + $0x538] sm:$0xff]  ;;  %v204_v24 = vld [vmem:[%s3009_s1 + $0x530] sm:$0xff] }
  0x77   :  { %v1423_v15 = vpack.c.bf16 %v196_v12, %v194_v11  ;;  %v207_v25 = vld [vmem:[%s3009_s1 + $0x548] sm:$0xff]  ;;  %v209_v26 = vld [vmem:[%s3009_s1 + $0x558] sm:$0xff]  ;;  %v208_v30 = vld [vmem:[%s3009_s1 + $0x550] sm:$0xff] }
  0x78   :  { %v211_v31 = vld [vmem:[%s3009_s1 + $0x568] sm:$0xff]  ;;  %v213_v32 = vld [vmem:[%s3009_s1 + $0x578] sm:$0xff]  ;;  %v214_v41 = vld [vmem:[%s3009_s1 + $0x580] sm:$0xff] }
  0x79   :  { %1384 = vmatpush1.bf16.msra.mxu0 %v1383_v16  ;;  %v1425_v16 = vpack.c.bf16 %v201_v14, %v199_v13  ;;  %v215_v37 = vld [vmem:[%s3009_s1 + $0x588] sm:$0xff]  ;;  %v217_v38 = vld [vmem:[%s3009_s1 + $0x598] sm:$0xff]  ;;  %v218_v47 = vld [vmem:[%s3009_s1 + $0x5a0] sm:$0xff] }
  0x7a   :  { %1386 = vmatprep.subr.bf16.mxu0 %v1385_v17  ;;  %v198_v17 = vld [vmem:[%s3009_s1 + $0x500] sm:$0xff]  ;;  %v1441_v40 = vpack.c.bf16 %v217_v38, %v215_v37  ;;  %v221_v44 = vld [vmem:[%s3009_s1 + $0x5b8] sm:$0xff]  ;;  %v605_v63 = vld [vmem:[%s3010_s2 + $0xc8] sm:$0xff] }
  0x7b   :  { %v1427_v21 = vpack.c.bf16 %v200_v18, %v198_v17  ;;  %v225_v50 = vld [vmem:[%s3009_s1 + $0x5d8] sm:$0xff]  ;;  %v222_v53 = vld [vmem:[%s3009_s1 + $0x5c0] sm:$0xff]  ;;  %v609_v5 = vld [vmem:[%s3010_s2 + $0xe8] sm:$0xff] }
  0x7c   :  { %v229_v56 = vld [vmem:[%s3009_s1 + $0x5f8] sm:$0xff]  ;;  %v226_v59 = vld [vmem:[%s3009_s1 + $0x5e0] sm:$0xff]  ;;  %v613_v12 = vld [vmem:[%s3010_s2 + $0x108] sm:$0xff] }
  0x7d   :  { %1388 = vmatpush1.bf16.msra.mxu0 %v1387_v22  ;;  %v1429_v22 = vpack.c.bf16 %v205_v20, %v203_v19  ;;  %v35_v62 = vld [vmem:[%s3008_s0 + $0x20] sm:$0xff]  ;;  %v607_v0 = vld [vmem:[%s3010_s2 + $0xd8] sm:$0xff]  ;;  %v617_v18 = vld [vmem:[%s3010_s2 + $0x128] sm:$0xff] }
  0x7e   :  { %1390 = vmatprep.subr.bf16.mxu0 %v1389_v23  ;;  %v202_v23 = vld [vmem:[%s3009_s1 + $0x520] sm:$0xff]  ;;  %v1513_v1 = vpack.c.bf16 %v607_v0, %v605_v63  ;;  %v611_v6 = vld [vmem:[%s3010_s2 + $0xf8] sm:$0xff] }
  0x7f   :  { %v1431_v27 = vpack.c.bf16 %v204_v24, %v202_v23  ;;  %v1517_v8 = vpack.c.bf16 %v611_v6, %v609_v5  ;;  %v615_v13 = vld [vmem:[%s3010_s2 + $0x118] sm:$0xff]  ;;  %v616_v20 = vld [vmem:[%s3010_s2 + $0x120] sm:$0xff]  ;;  %v621_v23 = vld [vmem:[%s3010_s2 + $0x148] sm:$0xff] }
  0x80   :  { %1514 = vmatprep.subr.bf16.mxu1 %v1513_v1  ;;  %v1521_v14 = vpack.c.bf16 %v615_v13, %v613_v12  ;;  %v619_v19 = vld [vmem:[%s3010_s2 + $0x138] sm:$0xff] }
  0x81   :  { %1392 = vmatpush1.bf16.msra.mxu0 %v1391_v28  ;;  %v1433_v28 = vpack.c.bf16 %v209_v26, %v207_v25  ;;  %v623_v24 = vld [vmem:[%s3010_s2 + $0x158] sm:$0xff] }
  0x82   :  { %1394 = vmatprep.subr.bf16.mxu0 %v1393_v29  ;;  %v206_v29 = vld [vmem:[%s3009_s1 + $0x540] sm:$0xff]  ;;  %v1529_v26 = vpack.c.bf16 %v623_v24, %v621_v23 }
  0x83   :  { %v1435_v33 = vpack.c.bf16 %v208_v30, %v206_v29  ;;  %v625_v29 = vld [vmem:[%s3010_s2 + $0x168] sm:$0xff]  ;;  %v627_v30 = vld [vmem:[%s3010_s2 + $0x178] sm:$0xff] }
  0x84   :  { %398 = vmatmul.mubr.f32.vlgmr.msra.gmra.mrb[0].mxu0 %v33_v34  ;;  %v1437_v34 = vpack.c.bf16 %v213_v32, %v211_v31  ;;  %v1533_v32 = vpack.c.bf16 %v627_v30, %v625_v29 }
  0x85   :  { %1396 = vmatpush1.bf16.msra.mxu0 %v1395_v35  ;;  %468 = vmatprep.mubr.f32.mxu0 %v36_v39  ;;  %v210_v35 = vld [vmem:[%s3009_s1 + $0x560] sm:$0xff] }
  0x86   :  { %1398 = vmatprep.subr.bf16.mxu0 %v1397_v36  ;;  %v212_v36 = vld [vmem:[%s3009_s1 + $0x570] sm:$0xff] }
  0x87   :  { %v1439_v39 = vpack.c.bf16 %v212_v36, %v210_v35  ;;  %v629_v35 = vld [vmem:[%s3010_s2 + $0x188] sm:$0xff]  ;;  %v631_v36 = vld [vmem:[%s3010_s2 + $0x198] sm:$0xff] }
  0x88   :  { %v1537_v38 = vpack.c.bf16 %v631_v36, %v629_v35  ;;  %v750_v35 = vld [vmem:[%s3011_s3 + $0x8] sm:$0xff] }
  0x89   :  { %1400 = vmatpush1.bf16.msra.mxu0 %v1399_v42  ;;  %v216_v42 = vld [vmem:[%s3009_s1 + $0x590] sm:$0xff] }
  0x8a   :  { %1402 = vmatprep.subr.bf16.mxu0 %v1401_v43  ;;  %v219_v43 = vld [vmem:[%s3009_s1 + $0x5a8] sm:$0xff]  ;;  %v1443_v45 = vpack.c.bf16 %v216_v42, %v214_v41  ;;  %v635_v42 = vld [vmem:[%s3010_s2 + $0x1b8] sm:$0xff] }
  0x8b   :  { %v1445_v46 = vpack.c.bf16 %v221_v44, %v219_v43  ;;  %v633_v41 = vld [vmem:[%s3010_s2 + $0x1a8] sm:$0xff] }
  0x8d   :  { %1404 = vmatpush1.bf16.msra.mxu0 %v1403_v48  ;;  %v220_v48 = vld [vmem:[%s3009_s1 + $0x5b0] sm:$0xff] }
  0x8e   :  { %1406 = vmatprep.subr.bf16.mxu0 %v1405_v49  ;;  %v223_v49 = vld [vmem:[%s3009_s1 + $0x5c8] sm:$0xff]  ;;  %v1447_v51 = vpack.c.bf16 %v220_v48, %v218_v47  ;;  %v634_v47 = vld [vmem:[%s3010_s2 + $0x1b0] sm:$0xff] }
  0x8f   :  { %v1449_v52 = vpack.c.bf16 %v225_v50, %v223_v49  ;;  %v637_v49 = vld [vmem:[%s3010_s2 + $0x1c8] sm:$0xff]  ;;  %v639_v50 = vld [vmem:[%s3010_s2 + $0x1d8] sm:$0xff] }
  0x91   :  { %1408 = vmatpush1.bf16.msra.mxu0 %v1407_v54  ;;  %v224_v54 = vld [vmem:[%s3009_s1 + $0x5d0] sm:$0xff] }
  0x92   :  { %1410 = vmatprep.subr.bf16.mxu0 %v1409_v55  ;;  %v227_v55 = vld [vmem:[%s3009_s1 + $0x5e8] sm:$0xff]  ;;  %v1451_v57 = vpack.c.bf16 %v224_v54, %v222_v53  ;;  %v636_v53 = vld [vmem:[%s3010_s2 + $0x1c0] sm:$0xff]  ;;  %v638_v54 = vld [vmem:[%s3010_s2 + $0x1d0] sm:$0xff] }
  0x93   :  { %v1453_v58 = vpack.c.bf16 %v229_v56, %v227_v55  ;;  %v641_v55 = vld [vmem:[%s3010_s2 + $0x1e8] sm:$0xff]  ;;  %v643_v56 = vld [vmem:[%s3010_s2 + $0x1f8] sm:$0xff] }
  0x95   :  { %1412 = vmatpush1.bf16.msra.mxu0 %v1411_v60  ;;  %v228_v60 = vld [vmem:[%s3009_s1 + $0x5f0] sm:$0xff] }
  0x96   :  { %1414 = vmatprep.subr.bf16.mxu0 %v1413_v61  ;;  %v1455_v61 = vpack.c.bf16 %v228_v60, %v226_v59  ;;  %v640_v59 = vld [vmem:[%s3010_s2 + $0x1e0] sm:$0xff]  ;;  %v642_v60 = vld [vmem:[%s3010_s2 + $0x1f0] sm:$0xff] }
  0x99   :  { %1416 = vmatpush1.bf16.msra.mxu0 %v1415_v2  ;;  %v604_v2 = vld [vmem:[%s3010_s2 + $0xc0] sm:$0xff] }
  0x9a   :  { %1418 = vmatprep.subr.bf16.mxu0 %v1417_v3  ;;  %v606_v3 = vld [vmem:[%s3010_s2 + $0xd0] sm:$0xff] }
  0x9b   :  { %v1515_v4 = vpack.c.bf16 %v606_v3, %v604_v2 }
  0x9d   :  { %1420 = vmatpush1.bf16.msra.mxu0 %v1419_v9  ;;  %1516 = vmatpush1.bf16.msra.mxu1 %v1515_v4  ;;  %v608_v9 = vld [vmem:[%s3010_s2 + $0xe0] sm:$0xff] }
  0x9e   :  { %1422 = vmatprep.subr.bf16.mxu0 %v1421_v10  ;;  %v610_v10 = vld [vmem:[%s3010_s2 + $0xf0] sm:$0xff]  ;;  %1518 = vmatprep.subr.bf16.mxu1 %v1517_v8 }
  0x9f   :  { %v1519_v11 = vpack.c.bf16 %v610_v10, %v608_v9 }
  0xa1   :  { %1424 = vmatpush1.bf16.msra.mxu0 %v1423_v15  ;;  %1520 = vmatpush1.bf16.msra.mxu1 %v1519_v11  ;;  %v612_v15 = vld [vmem:[%s3010_s2 + $0x100] sm:$0xff] }
  0xa2   :  { %1426 = vmatprep.subr.bf16.mxu0 %v1425_v16  ;;  %v614_v16 = vld [vmem:[%s3010_s2 + $0x110] sm:$0xff]  ;;  %1522 = vmatprep.subr.bf16.mxu1 %v1521_v14 }
  0xa3   :  { %v1523_v17 = vpack.c.bf16 %v614_v16, %v612_v15 }
  0xa5   :  { %1428 = vmatpush1.bf16.msra.mxu0 %v1427_v21  ;;  %1524 = vmatpush1.bf16.msra.mxu1 %v1523_v17  ;;  %v1525_v21 = vpack.c.bf16 %v619_v19, %v617_v18 }
  0xa6   :  { %1430 = vmatprep.subr.bf16.mxu0 %v1429_v22  ;;  %v618_v22 = vld [vmem:[%s3010_s2 + $0x130] sm:$0xff] }
  0xa7   :  { %v1527_v25 = vpack.c.bf16 %v618_v22, %v616_v20  ;;  %1526 = vmatprep.subr.bf16.mxu1 %v1525_v21 }
  0xa9   :  { %1432 = vmatpush1.bf16.msra.mxu0 %v1431_v27  ;;  %v620_v27 = vld [vmem:[%s3010_s2 + $0x140] sm:$0xff]  ;;  %1528 = vmatpush1.bf16.msra.mxu1 %v1527_v25 }
  0xaa   :  { %1434 = vmatprep.subr.bf16.mxu0 %v1433_v28  ;;  %v622_v28 = vld [vmem:[%s3010_s2 + $0x150] sm:$0xff]  ;;  %1530 = vmatprep.subr.bf16.mxu1 %v1529_v26 }
  0xab   :  { %v1531_v31 = vpack.c.bf16 %v622_v28, %v620_v27 }
  0xad   :  { %1436 = vmatpush1.bf16.msra.mxu0 %v1435_v33  ;;  %v624_v33 = vld [vmem:[%s3010_s2 + $0x160] sm:$0xff]  ;;  %1532 = vmatpush1.bf16.msra.mxu1 %v1531_v31 }
  0xae   :  { %1438 = vmatprep.subr.bf16.mxu0 %v1437_v34  ;;  %v626_v34 = vld [vmem:[%s3010_s2 + $0x170] sm:$0xff]  ;;  %1534 = vmatprep.subr.bf16.mxu1 %v1533_v32  ;;  %v765_v31 = vld [vmem:[%s3011_s3 + $0x80] sm:$0xff]  ;;  %v766_v32 = vld [vmem:[%s3011_s3 + $0x88] sm:$0xff] }
  0xaf   :  { %v1535_v37 = vpack.c.bf16 %v626_v34, %v624_v33  ;;  %v1553_v33 = vpack.c.bf16 %v766_v32, %v765_v31  ;;  %v749_v34 = vld [vmem:[%s3011_s3] sm:$0xff] }
  0xb0   :  { %v1555_v36 = vpack.c.bf16 %v750_v35, %v749_v34 }
  0xb1   :  { %1440 = vmatpush1.bf16.msra.mxu0 %v1439_v39  ;;  %v628_v39 = vld [vmem:[%s3010_s2 + $0x180] sm:$0xff]  ;;  %1536 = vmatpush1.bf16.msra.mxu1 %v1535_v37  ;;  %v767_v37 = vld [vmem:[%s3011_s3 + $0x90] sm:$0xff] }
  0xb2   :  { %1442 = vmatprep.subr.bf16.mxu0 %v1441_v40  ;;  %v630_v40 = vld [vmem:[%s3010_s2 + $0x190] sm:$0xff]  ;;  %1538 = vmatprep.subr.bf16.mxu1 %v1537_v38  ;;  %v768_v38 = vld [vmem:[%s3011_s3 + $0x98] sm:$0xff] }
  0xb3   :  { %v1539_v43 = vpack.c.bf16 %v630_v40, %v628_v39  ;;  %v1557_v39 = vpack.c.bf16 %v768_v38, %v767_v37  ;;  %v751_v40 = vld [vmem:[%s3011_s3 + $0x10] sm:$0xff] }
  0xb5   :  { %1444 = vmatpush1.bf16.msra.mxu0 %v1443_v45  ;;  %v1541_v45 = vpack.c.bf16 %v635_v42, %v633_v41  ;;  %1540 = vmatpush1.bf16.msra.mxu1 %v1539_v43  ;;  %v752_v41 = vld [vmem:[%s3011_s3 + $0x18] sm:$0xff]  ;;  %v769_v43 = vld [vmem:[%s3011_s3 + $0xa0] sm:$0xff] }
  0xb6   :  { %1446 = vmatprep.subr.bf16.mxu0 %v1445_v46  ;;  %v632_v46 = vld [vmem:[%s3010_s2 + $0x1a0] sm:$0xff]  ;;  %v1559_v42 = vpack.c.bf16 %v752_v41, %v751_v40 }
  0xb7   :  { %1542 = vmatprep.subr.bf16.mxu1 %v1541_v45 }
  0xb9   :  { %1448 = vmatpush1.bf16.msra.mxu0 %v1447_v51  ;;  %v1543_v51 = vpack.c.bf16 %v634_v47, %v632_v46  ;;  %v753_v46 = vld [vmem:[%s3011_s3 + $0x20] sm:$0xff]  ;;  %v754_v47 = vld [vmem:[%s3011_s3 + $0x28] sm:$0xff] }
  0xba   :  { %1450 = vmatprep.subr.bf16.mxu0 %v1449_v52  ;;  %v1545_v52 = vpack.c.bf16 %v639_v50, %v637_v49  ;;  %v771_v49 = vld [vmem:[%s3011_s3 + $0xb0] sm:$0xff]  ;;  %v772_v50 = vld [vmem:[%s3011_s3 + $0xb8] sm:$0xff] }
  0xbb   :  { %1544 = vmatpush1.bf16.msra.mxu1 %v1543_v51  ;;  %v1565_v51 = vpack.c.bf16 %v772_v50, %v771_v49  ;;  %v1788_v49 = vmov 0.0|0.0   ;;  %v870_v50 = vld [vmem:[%s3012_s4 + $0x10] sm:$0xff] }
  0xbc   :  { %1546 = vmatprep.subr.bf16.mxu1 %v1545_v52  ;;  %v755_v52 = vld [vmem:[%s3011_s3 + $0x30] sm:$0xff] }
  0xbd   :  { %1452 = vmatpush1.bf16.msra.mxu0 %v1451_v57  ;;  %v1547_v57 = vpack.c.bf16 %v638_v54, %v636_v53  ;;  %v756_v53 = vld [vmem:[%s3011_s3 + $0x38] sm:$0xff] }
  0xbe   :  { %1454 = vmatprep.subr.bf16.mxu0 %v1453_v58  ;;  %v1549_v58 = vpack.c.bf16 %v643_v56, %v641_v55  ;;  %v1567_v54 = vpack.c.bf16 %v756_v53, %v755_v52  ;;  %v773_v55 = vld [vmem:[%s3011_s3 + $0xc0] sm:$0xff]  ;;  %v774_v56 = vld [vmem:[%s3011_s3 + $0xc8] sm:$0xff] }
  0xbf   :  { %1548 = vmatpush1.bf16.msra.mxu1 %v1547_v57  ;;  %v1569_v57 = vpack.c.bf16 %v774_v56, %v773_v55  ;;  %v872_v52 = vld [vmem:[%s3012_s4 + $0x20] sm:$0xff]  ;;  %v874_v56 = vld [vmem:[%s3012_s4 + $0x30] sm:$0xff] }
  0xc0   :  { %1550 = vmatprep.subr.bf16.mxu1 %v1549_v58  ;;  %v757_v58 = vld [vmem:[%s3011_s3 + $0x40] sm:$0xff] }
  0xc1   :  { %1456 = vmatpush1.bf16.msra.mxu0 %v1455_v61  ;;  %v1551_v61 = vpack.c.bf16 %v642_v60, %v640_v59  ;;  %v758_v59 = vld [vmem:[%s3011_s3 + $0x48] sm:$0xff] }
  0xc2   :  { %v1571_v60 = vpack.c.bf16 %v758_v59, %v757_v58  ;;  %v876_v59 = vld [vmem:[%s3012_s4 + $0x40] sm:$0xff] }
  0xc3   :  { %1552 = vmatpush1.bf16.msra.mxu1 %v1551_v61  ;;  %v775_v61 = vld [vmem:[%s3011_s3 + $0xd0] sm:$0xff] }
  0xc4   :  { %469 = vmatmul.mubr.f32.vlgmr.msra.gmra.mrb[0].mxu0 %v35_v62  ;;  %1554 = vmatprep.subr.bf16.mxu1 %v1553_v33 }
 0x12d   :  { %v541_v44 = vpop.f32.mrb[0].mxu1 }
 0x12e   :  { %v543_v48 = vpop.f32.mrb[1].mxu1 }
 0x197   :  { %v470_v62 = vpop.f32.mrb[0].mxu0 }
 0x198   :  { %v1633_v63 = vadd.f32 %v541_v44, %v470_v62  ;;  %v472_v0 = vpop.f32.mrb[1].mxu0  ;;  %v770_v44 = vld [vmem:[%s3011_s3 + $0xa8] sm:$0xff]  ;;  %v776_v62 = vld [vmem:[%s3011_s3 + $0xd8] sm:$0xff] }
 0x199   :  { %v1634_v1 = vadd.f32 %v543_v48, %v472_v0  ;;  %v1561_v45 = vpack.c.bf16 %v770_v44, %v769_v43  ;;  %v1563_v48 = vpack.c.bf16 %v754_v47, %v753_v46  ;;  %v759_v0 = vld [vmem:[%s3011_s3 + $0x50] sm:$0xff]  ;;  %v868_v46 = vld [vmem:[%s3012_s4] sm:$0xff]  ;;  %v869_v47 = vld [vmem:[%s3012_s4 + $0x8] sm:$0xff] }
 0x19a   :  { %v546_v2 = vmul.f32 10.0, %v1633_v63 }
 0x19b   :  { %v547_v3 = vmul.f32 10.0, %v1634_v1 }
 0x19c   :  { %v548_v4 = vmin.f32 %v546_v2, 20.0  ;;  %vm574_vm2 = vcmp.gt.f32.partialorder %v546_v2, 20.0 }
 0x19d   :  { %v549_v5 = vmin.f32 %v547_v3, 20.0  ;;  %vm575_vm3 = vcmp.gt.f32.partialorder %v547_v3, 20.0  ;;  %v777_v3 = vld [vmem:[%s3011_s3 + $0xe0] sm:$0xff] }
 0x19e   :  { %v550_v6 = vmul.f32 1.442695, %v548_v4  ;;  %v778_v4 = vld [vmem:[%s3011_s3 + $0xe8] sm:$0xff] }
 0x19f   :  { %v552_v8 = vmul.f32 1.442695, %v549_v5  ;;  %v1577_v5 = vpack.c.bf16 %v778_v4, %v777_v3  ;;  %v882_v4 = vld [vmem:[%s3012_s4 + $0x70] sm:$0xff] }
 0x1a0   :  { %1647 = vpow2.f32 %v550_v6  ;;  %v761_v6 = vld [vmem:[%s3011_s3 + $0x60] sm:$0xff] }
 0x1a1   :  { %1649 = vpow2.f32 %v552_v8  ;;  %v762_v8 = vld [vmem:[%s3011_s3 + $0x68] sm:$0xff] }
 0x1aa   :  { %v1648_v9 = vpop.eup %1647 }
 0x1ab   :  { %v1650_v10 = vpop.eup %1649  ;;  %v554_v11 = vadd.f32 1.0, %v1648_v9  ;;  %v557_v13 = vmul.f32 -0.5, %v1648_v9  ;;  %v560_v17 = vand.u32 2147483647, %v1648_v9 }
 0x1ac   :  { %v563_v12 = vadd.f32 1.0, %v1650_v10  ;;  %v566_v14 = vmul.f32 -0.5, %v1650_v10  ;;  %v569_v18 = vand.u32 2147483647, %v1650_v10 }
 0x1ad   :  { %1651 = vlog2.f32 %v554_v11  ;;  %v558_v15 = vadd.f32 1.0, %v557_v13  ;;  %vm561_vm0 = vcmp.lt.f32.partialorder %v560_v17, 0.0004427343  ;;  %v780_v11 = vld [vmem:[%s3011_s3 + $0xf8] sm:$0xff]  ;;  %v763_v13 = vld [vmem:[%s3011_s3 + $0x70] sm:$0xff] }
 0x1ae   :  { %1653 = vlog2.f32 %v563_v12  ;;  %v567_v16 = vadd.f32 1.0, %v566_v14  ;;  %vm570_vm1 = vcmp.lt.f32.partialorder %v569_v18, 0.0004427343  ;;  %v764_v14 = vld [vmem:[%s3011_s3 + $0x78] sm:$0xff] }
 0x1af   :  { %v559_v22 = vmul.f32 %v1648_v9, %v558_v15  ;;  %v1579_v9 = vpack.c.bf16 %v762_v8, %v761_v6  ;;  %v1583_v15 = vpack.c.bf16 %v764_v14, %v763_v13 }
 0x1b0   :  { %v568_v24 = vmul.f32 %v1650_v10, %v567_v16  ;;  %v779_v10 = vld [vmem:[%s3011_s3 + $0xf0] sm:$0xff] }
 0x1b1   :  { %v1581_v12 = vpack.c.bf16 %v780_v11, %v779_v10 }
 0x1b7   :  { %v1652_v19 = vpop.eup %1651 }
 0x1b8   :  { %v1654_v20 = vpop.eup %1653  ;;  %v556_v21 = vmul.f32 0.6931472, %v1652_v19 }
 0x1b9   :  { %v565_v23 = vmul.f32 0.6931472, %v1654_v20 }
 0x1ba   :  { %v562_v25 = vsel %vm561_vm0, %v559_v22, %v556_v21 }
 0x1bb   :  { %v571_v26 = vsel %vm570_vm1, %v568_v24, %v565_v23  ;;  %v572_v27 = vmul.f32 0.1, %v562_v25 }
 0x1bc   :  { %v573_v28 = vmul.f32 0.1, %v571_v26 }
 0x1bd   :  { %v576_v29 = vsel %vm574_vm2, %v1633_v63, %v572_v27  ;;  %v1573_v63 = vpack.c.bf16 %v776_v62, %v775_v61  ;;  %v878_v62 = vld [vmem:[%s3012_s4 + $0x50] sm:$0xff] }
 0x1be   :  { %v577_v30 = vsel %vm575_vm3, %v1634_v1, %v573_v28  ;;  %578 = vst [vmem:[#allocation2] sm:$0xff] %v576_v29  ;;  %v760_v1 = vld [vmem:[%s3011_s3 + $0x58] sm:$0xff] }
 0x1bf   :  { %708 = vmatprep.mubr.f32.mxu1 %v577_v30  ;;  %579 = vst [vmem:[#allocation2 + $0x8] sm:$0xff] %v577_v30  ;;  %v1575_v2 = vpack.c.bf16 %v760_v1, %v759_v0  ;;  %v880_v1 = vld [vmem:[%s3012_s4 + $0x60] sm:$0xff] }
 0x1c0   :  { %709 = vmatmul.mubr.f32.vlgmr.msra.gmra.mrb[2].mxu1 %v576_v29 }
 0x1c1   :  { %1556 = vmatpush3.bf16.msra.mxu1 %v1555_v36 }
 0x1c2   :  { %1558 = vmatprep.subr.bf16.mxu1 %v1557_v39 }
 0x1c5   :  { %1560 = vmatpush3.bf16.msra.mxu1 %v1559_v42 }
 0x1c6   :  { %1562 = vmatprep.subr.bf16.mxu1 %v1561_v45 }
 0x1c9   :  { %1564 = vmatpush3.bf16.msra.mxu1 %v1563_v48  ;;  %v1586_v48 = vpack.c.bf16 %v869_v47, %v868_v46  ;;  %v986_v46 = vld [vmem:[%s3013_s5 + $0x78] sm:$0xff] }
 0x1ca   :  { %1566 = vmatprep.subr.bf16.mxu1 %v1565_v51  ;;  %v871_v51 = vld [vmem:[%s3012_s4 + $0x18] sm:$0xff] }
 0x1cb   :  { %v1589_v53 = vpack.c.bf16 %v871_v51, %v870_v50 }
 0x1cd   :  { %1568 = vmatpush3.bf16.msra.mxu1 %v1567_v54  ;;  %v873_v54 = vld [vmem:[%s3012_s4 + $0x28] sm:$0xff] }
 0x1ce   :  { %1570 = vmatprep.subr.bf16.mxu1 %v1569_v57  ;;  %v1592_v55 = vpack.c.bf16 %v873_v54, %v872_v52  ;;  %v875_v57 = vld [vmem:[%s3012_s4 + $0x38] sm:$0xff] }
 0x1cf   :  { %v1595_v58 = vpack.c.bf16 %v875_v57, %v874_v56 }
 0x1d1   :  { %1572 = vmatpush3.bf16.msra.mxu1 %v1571_v60  ;;  %v877_v60 = vld [vmem:[%s3012_s4 + $0x48] sm:$0xff] }
 0x1d2   :  { %1574 = vmatprep.subr.bf16.mxu1 %v1573_v63  ;;  %v1598_v61 = vpack.c.bf16 %v877_v60, %v876_v59  ;;  %v879_v63 = vld [vmem:[%s3012_s4 + $0x58] sm:$0xff] }
 0x1d3   :  { %v1601_v0 = vpack.c.bf16 %v879_v63, %v878_v62 }
 0x1d5   :  { %1576 = vmatpush3.bf16.msra.mxu1 %v1575_v2  ;;  %v881_v2 = vld [vmem:[%s3012_s4 + $0x68] sm:$0xff] }
 0x1d6   :  { %1578 = vmatprep.subr.bf16.mxu1 %v1577_v5  ;;  %v1604_v3 = vpack.c.bf16 %v881_v2, %v880_v1  ;;  %v883_v5 = vld [vmem:[%s3012_s4 + $0x78] sm:$0xff] }
 0x1d7   :  { %v1607_v6 = vpack.c.bf16 %v883_v5, %v882_v4 }
 0x1d9   :  { %1580 = vmatpush3.bf16.msra.mxu1 %v1579_v9 }
 0x1da   :  { %1582 = vmatprep.subr.bf16.mxu1 %v1581_v12 }
 0x1dd   :  { %1584 = vmatpush3.bf16.msra.mxu1 %v1583_v15 }
 0x1de   :  { %1585 = vmatprep.subr.bf16.mxu1 %v1788_v49 }
 0x293   :  { %v710_v16 = vpop.f32.mrb[2].mxu1 }
 0x294   :  { %v715_v17 = vmul.f32 10.0, %v710_v16  ;;  %v712_v18 = vpop.f32.mrb[3].mxu1 }
 0x295   :  { %v716_v19 = vmul.f32 10.0, %v712_v18 }
 0x296   :  { %v717_v20 = vmin.f32 %v715_v17, 20.0  ;;  %vm743_vm6 = vcmp.gt.f32.partialorder %v715_v17, 20.0 }
 0x297   :  { %v718_v21 = vmin.f32 %v716_v19, 20.0  ;;  %vm744_vm7 = vcmp.gt.f32.partialorder %v716_v19, 20.0 }
 0x298   :  { %v719_v22 = vmul.f32 1.442695, %v717_v20 }
 0x299   :  { %v721_v23 = vmul.f32 1.442695, %v718_v21 }
 0x29a   :  { %1655 = vpow2.f32 %v719_v22 }
 0x29b   :  { %1657 = vpow2.f32 %v721_v23 }
 0x2a4   :  { %v1656_v24 = vpop.eup %1655 }
 0x2a5   :  { %v1658_v25 = vpop.eup %1657  ;;  %v723_v26 = vadd.f32 1.0, %v1656_v24  ;;  %v726_v28 = vmul.f32 -0.5, %v1656_v24  ;;  %v729_v31 = vand.u32 2147483647, %v1656_v24 }
 0x2a6   :  { %v732_v27 = vadd.f32 1.0, %v1658_v25  ;;  %v735_v29 = vmul.f32 -0.5, %v1658_v25  ;;  %v738_v33 = vand.u32 2147483647, %v1658_v25 }
 0x2a7   :  { %1659 = vlog2.f32 %v723_v26  ;;  %v727_v30 = vadd.f32 1.0, %v726_v28  ;;  %vm730_vm4 = vcmp.lt.f32.partialorder %v729_v31, 0.0004427343  ;;  %v972_v26 = vld [vmem:[%s3013_s5 + $0x8] sm:$0xff]  ;;  %v973_v28 = vld [vmem:[%s3013_s5 + $0x10] sm:$0xff] }
 0x2a8   :  { %1661 = vlog2.f32 %v732_v27  ;;  %v736_v32 = vadd.f32 1.0, %v735_v29  ;;  %vm739_vm5 = vcmp.lt.f32.partialorder %v738_v33, 0.0004427343  ;;  %v976_v31 = vld [vmem:[%s3013_s5 + $0x28] sm:$0xff]  ;;  %v977_v33 = vld [vmem:[%s3013_s5 + $0x30] sm:$0xff] }
 0x2a9   :  { %v728_v37 = vmul.f32 %v1656_v24, %v727_v30  ;;  %v975_v30 = vld [vmem:[%s3013_s5 + $0x20] sm:$0xff] }
 0x2aa   :  { %v737_v39 = vmul.f32 %v1658_v25, %v736_v32  ;;  %v971_v25 = vld [vmem:[%s3013_s5] sm:$0xff]  ;;  %v1616_v32 = vpack.c.bf16 %v976_v31, %v975_v30 }
 0x2ab   :  { %v1610_v27 = vpack.c.bf16 %v972_v26, %v971_v25 }
 0x2b1   :  { %v1660_v34 = vpop.eup %1659 }
 0x2b2   :  { %v1662_v35 = vpop.eup %1661  ;;  %v725_v36 = vmul.f32 0.6931472, %v1660_v34  ;;  %v978_v34 = vld [vmem:[%s3013_s5 + $0x38] sm:$0xff] }
 0x2b3   :  { %v734_v38 = vmul.f32 0.6931472, %v1662_v35  ;;  %v1619_v35 = vpack.c.bf16 %v978_v34, %v977_v33 }
 0x2b4   :  { %v731_v40 = vsel %vm730_vm4, %v728_v37, %v725_v36  ;;  %v979_v36 = vld [vmem:[%s3013_s5 + $0x40] sm:$0xff]  ;;  %v980_v37 = vld [vmem:[%s3013_s5 + $0x48] sm:$0xff] }
 0x2b5   :  { %v741_v41 = vmul.f32 0.1, %v731_v40  ;;  %v740_v42 = vsel %vm739_vm5, %v737_v39, %v734_v38  ;;  %v1622_v38 = vpack.c.bf16 %v980_v37, %v979_v36  ;;  %v981_v39 = vld [vmem:[%s3013_s5 + $0x50] sm:$0xff]  ;;  %v982_v40 = vld [vmem:[%s3013_s5 + $0x58] sm:$0xff] }
 0x2b6   :  { %v742_v43 = vmul.f32 0.1, %v740_v42  ;;  %v983_v42 = vld [vmem:[%s3013_s5 + $0x60] sm:$0xff] }
 0x2b7   :  { %v745_v44 = vsel %vm743_vm6, %v710_v16, %v741_v41  ;;  %v1625_v41 = vpack.c.bf16 %v982_v40, %v981_v39 }
 0x2b8   :  { %747 = vst [vmem:[#allocation4] sm:$0xff] %v745_v44  ;;  %v746_v45 = vsel %vm744_vm7, %v712_v18, %v742_v43  ;;  %v984_v43 = vld [vmem:[%s3013_s5 + $0x68] sm:$0xff] }
 0x2b9   :  { %845 = vmatprep.mubr.f32.mxu1 %v746_v45  ;;  %748 = vst [vmem:[#allocation4 + $0x8] sm:$0xff] %v746_v45  ;;  %v985_v45 = vld [vmem:[%s3013_s5 + $0x70] sm:$0xff] }
 0x2ba   :  { %846 = vmatmul.mubr.f32.vlgmr.msra.gmra.mrb[4].mxu1 %v745_v44  ;;  %v1628_v44 = vpack.c.bf16 %v984_v43, %v983_v42  ;;  %v1631_v47 = vpack.c.bf16 %v986_v46, %v985_v45 }
 0x2bb   :  { %1587 = vmatpush3.bf16.msra.mxu1 %v1586_v48  ;;  %1227 = vmatprep.mubr.msk.f32.mxu1 %vm1789_vm8, %v1787_v7 }
 0x2bc   :  { %1588 = vmatprep.subr.bf16.mxu1 %v1788_v49 }
 0x2bf   :  { %1590 = vmatpush3.bf16.msra.mxu1 %v1589_v53 }
 0x2c0   :  { %1591 = vmatprep.subr.bf16.mxu1 %v1788_v49 }
 0x2c3   :  { %1593 = vmatpush3.bf16.msra.mxu1 %v1592_v55 }
 0x2c4   :  { %1594 = vmatprep.subr.bf16.mxu1 %v1788_v49 }
 0x2c7   :  { %1596 = vmatpush3.bf16.msra.mxu1 %v1595_v58 }
 0x2c8   :  { %1597 = vmatprep.subr.bf16.mxu1 %v1788_v49 }
 0x2cb   :  { %1599 = vmatpush3.bf16.msra.mxu1 %v1598_v61 }
 0x2cc   :  { %1600 = vmatprep.subr.bf16.mxu1 %v1788_v49 }
 0x2cf   :  { %1602 = vmatpush3.bf16.msra.mxu1 %v1601_v0 }
 0x2d0   :  { %1603 = vmatprep.subr.bf16.mxu1 %v1788_v49 }
 0x2d3   :  { %1605 = vmatpush3.bf16.msra.mxu1 %v1604_v3 }
 0x2d4   :  { %1606 = vmatprep.subr.bf16.mxu1 %v1788_v49 }
 0x2d7   :  { %1608 = vmatpush3.bf16.msra.mxu1 %v1607_v6 }
 0x2d8   :  { %1609 = vmatprep.subr.bf16.mxu1 %v1788_v49 }
 0x38d   :  { %v1158_v8 = vpop.f32.mrb[4].mxu1 }
 0x38e   :  { %v1159_v9 = vpop.f32.mrb[5].mxu1 }
 0x38f   :  { %v1160_v10 = vadd.f32 %v1159_v9, %v1158_v8 }
 0x391   :  { %v851_v11 = vmul.f32 10.0, %v1160_v10 }
 0x393   :  { %v852_v12 = vmin.f32 %v851_v11, 20.0  ;;  %vm865_vm10 = vcmp.gt.f32.partialorder %v851_v11, 20.0 }
 0x395   :  { %v853_v13 = vmul.f32 1.442695, %v852_v12 }
 0x397   :  { %1663 = vpow2.f32 %v853_v13 }
 0x3a1   :  { %v1664_v14 = vpop.eup %1663 }
 0x3a2   :  { %v855_v15 = vadd.f32 1.0, %v1664_v14  ;;  %v858_v16 = vmul.f32 -0.5, %v1664_v14  ;;  %v861_v18 = vand.u32 2147483647, %v1664_v14 }
 0x3a4   :  { %1665 = vlog2.f32 %v855_v15  ;;  %v859_v17 = vadd.f32 1.0, %v858_v16  ;;  %vm862_vm9 = vcmp.lt.f32.partialorder %v861_v18, 0.0004427343 }
 0x3a6   :  { %v860_v21 = vmul.f32 %v1664_v14, %v859_v17 }
 0x3ae   :  { %v1666_v19 = vpop.eup %1665 }
 0x3af   :  { %v857_v20 = vmul.f32 0.6931472, %v1666_v19 }
 0x3b1   :  { %v863_v22 = vsel %vm862_vm9, %v860_v21, %v857_v20 }
 0x3b2   :  { %v864_v23 = vmul.f32 0.1, %v863_v22 }
 0x3b4   :  { %v866_v24 = vsel %vm865_vm10, %v1160_v10, %v864_v23 }
 0x3b5   :  { %1228 = vmatmul.mubr.f32.vlgmr.msra.gmra.mrb[6].mxu1 %v866_v24  ;;  %867 = vst [vmem:[#allocation6] sm:$0xff] %v866_v24 }
 0x3b6   :  { %1262 = vmatprep.mubr.msk.f32.mxu1 %vm1789_vm8, %v1787_v7  ;;  %1611 = vmatpush3.bf16.msra.mxu1 %v1610_v27  ;;  %v974_v7 = vld [vmem:[%s3013_s5 + $0x18] sm:$0xff]  ;;  %s1790_s5 = smov [#allocation4]  }
 0x3b7   :  { %1612 = vmatprep.subr.bf16.mxu1 %v1788_v49  ;;  %v1613_v29 = vpack.c.bf16 %v974_v7, %v973_v28  ;;  %s1074_s22 = sshll.u32 %s1790_s5, 4  ;;  %s1075_s22 = int_to_ptr.vmem [resolvable:$true] %s1074_s22 }
 0x3b8   :  { %s1671_s25 = scalar_lea.vmem %s1075_s22, 256  ;;  %p1676_p1 = scmp.lt.s32.totalorder %s1075_s22, %s1075_s22 }
 0x3b9   :  { %p1672_p0 = scmp.ne.s32.totalorder %s1075_s22, %s1671_s25  ;;  %p1677_p2 = scmp.lt.s32.totalorder %s1671_s25, %s1671_s25 }
 0x3ba   :  { %1614 = vmatpush3.bf16.msra.mxu1 %v1613_v29 }
 0x3bb   :  { %1615 = vmatprep.subr.bf16.mxu1 %v1788_v49  ;;  %p1678_p3 = por %p1677_p2, %p1676_p1 }
 0x3bd   :  { %p1679_p4 = pnand %p1678_p3, %p1672_p0 }
 0x3be   :  { %1617 = vmatpush3.bf16.msra.mxu1 %v1616_v32 }
 0x3bf   :  { %1618 = vmatprep.subr.bf16.mxu1 %v1788_v49 }
 0x3c2   :  { %1620 = vmatpush3.bf16.msra.mxu1 %v1619_v35 }
 0x3c3   :  { %1621 = vmatprep.subr.bf16.mxu1 %v1788_v49 }
 0x3c6   :  { %1623 = vmatpush3.bf16.msra.mxu1 %v1622_v38 }
 0x3c7   :  { %1624 = vmatprep.subr.bf16.mxu1 %v1788_v49 }
 0x3ca   :  { %1626 = vmatpush3.bf16.msra.mxu1 %v1625_v41 }
 0x3cb   :  { %1627 = vmatprep.subr.bf16.mxu1 %v1788_v49 }
 0x3ce   :  { %1629 = vmatpush3.bf16.msra.mxu1 %v1628_v44 }
 0x3cf   :  { %1630 = vmatprep.subr.bf16.mxu1 %v1788_v49 }
 0x3d2   :  { %1632 = vmatpush3.bf16.msra.mxu1 %v1631_v47 }
 0x488   :  { %v950_v48 = vpop.f32.mrb[6].mxu1 }
 0x489   :  { %v954_v50 = vmul.f32 10.0, %v950_v48  ;;  %v1229_v51 = vpop.f32.mrb[7].mxu1 }
 0x48b   :  { %v955_v52 = vmin.f32 %v954_v50, 20.0  ;;  %vm968_vm12 = vcmp.gt.f32.partialorder %v954_v50, 20.0 }
 0x48d   :  { %v956_v53 = vmul.f32 1.442695, %v955_v52 }
 0x48f   :  { %1667 = vpow2.f32 %v956_v53 }
 0x499   :  { %v1668_v54 = vpop.eup %1667 }
 0x49a   :  { %v958_v55 = vadd.f32 1.0, %v1668_v54  ;;  %v961_v49 = vmul.f32 -0.5, %v1668_v54  ;;  %v964_v57 = vand.u32 2147483647, %v1668_v54 }
 0x49c   :  { %1669 = vlog2.f32 %v958_v55  ;;  %v962_v56 = vadd.f32 1.0, %v961_v49  ;;  %vm965_vm11 = vcmp.lt.f32.partialorder %v964_v57, 0.0004427343 }
 0x49e   :  { %v963_v60 = vmul.f32 %v1668_v54, %v962_v56 }
 0x4a6   :  { %v1670_v58 = vpop.eup %1669 }
 0x4a7   :  { %v960_v59 = vmul.f32 0.6931472, %v1670_v58 }
 0x4a9   :  { %v966_v61 = vsel %vm965_vm11, %v963_v60, %v960_v59 }
 0x4aa   :  { %v967_v62 = vmul.f32 0.1, %v966_v61 }
 0x4ac   :  { %v969_v63 = vsel %vm968_vm12, %v950_v48, %v967_v62 }
 0x4ad   :  { %970 = vst [vmem:[#allocation7] sm:$0xff] %v969_v63  ;;  %1263 = vmatmul.mubr.f32.vlgmr.msra.gmra.mrb[8].mxu1 %v969_v63 }
 0x4ae   :  { %1682 = shalt.err (!%p1679_p4)
}
 0x4af   :  { %s1683_s1 = scalar_lea.hbm %s3015_s7, 256 }
 0x4b0   :  { %p1684_p5 = scmp.ne.s32.totalorder %s3015_s7, %s1683_s1  ;;  %p1687_p6 = scmp.lt.u32.totalorder %s1683_s1, %s3015_s7 }
 0x4b2   :  { %p1689_p7 = pnand %p1687_p6, %p1684_p5 }
 0x4b4   :  { %1692 = shalt.err (!%p1689_p7)
}
 0x4b5   :  { %1077 = dma.vmem_to_hbm [thread:$0]  %s1075_s22, 256, %s3015_s7, [#allocation5]  }
 0x4b6   :  { %s1693_s12 = scalar_lea.vmem %s1095_s24, 128  ;;  %p1698_p9 = scmp.lt.s32.totalorder %s1095_s24, %s1095_s24 }
 0x4b7   :  { %p1694_p8 = scmp.ne.s32.totalorder %s1095_s24, %s1693_s12  ;;  %p1699_p10 = scmp.lt.s32.totalorder %s1693_s12, %s1693_s12 }
 0x4b9   :  { %p1700_p11 = por %p1699_p10, %p1698_p9 }
 0x4bb   :  { %p1701_p12 = pnand %p1700_p11, %p1694_p8 }
 0x4bd   :  { %1704 = shalt.err (!%p1701_p12)
}
 0x4be   :  { %s1705_s2 = scalar_lea.hbm %s3017_s9, 128 }
 0x4bf   :  { %p1706_p13 = scmp.ne.s32.totalorder %s3017_s9, %s1705_s2  ;;  %p1709_p0 = scmp.lt.u32.totalorder %s1705_s2, %s3017_s9 }
 0x4c1   :  { %p1711_p1 = pnand %p1709_p0, %p1706_p13 }
 0x4c3   :  { %1714 = shalt.err (!%p1711_p1)
}
 0x4c4   :  { %1097 = dma.vmem_to_hbm [thread:$0]  %s1095_s24, 128, %s3017_s9, [#allocation8]  }
 0x4c5   :  { %s1792_s19 = smov [#allocation2]   ;;  %s1793_s21 = smov [#allocation6]  }
 0x4c6   :  { %s1064_s20 = sshll.u32 %s1792_s19, 4  ;;  %s1084_s5 = sshll.u32 %s1793_s21, 4  ;;  %s1065_s20 = int_to_ptr.vmem [resolvable:$true] %s1064_s20  ;;  %s1085_s5 = int_to_ptr.vmem [resolvable:$true] %s1084_s5 }
 0x4c7   :  { %s1715_s22 = scalar_lea.vmem %s1065_s20, 256  ;;  %p1720_p3 = scmp.lt.s32.totalorder %s1065_s20, %s1065_s20 }
 0x4c8   :  { %p1716_p2 = scmp.ne.s32.totalorder %s1065_s20, %s1715_s22  ;;  %p1721_p4 = scmp.lt.s32.totalorder %s1715_s22, %s1715_s22 }
 0x4ca   :  { %p1722_p5 = por %p1721_p4, %p1720_p3 }
 0x4cc   :  { %p1723_p6 = pnand %p1722_p5, %p1716_p2 }
 0x4ce   :  { %1726 = shalt.err (!%p1723_p6)
}
 0x4cf   :  { %s1727_s26 = scalar_lea.hbm %s3014_s6, 256 }
 0x4d0   :  { %p1728_p7 = scmp.ne.s32.totalorder %s3014_s6, %s1727_s26  ;;  %p1731_p8 = scmp.lt.u32.totalorder %s1727_s26, %s3014_s6 }
 0x4d2   :  { %p1733_p9 = pnand %p1731_p8, %p1728_p7 }
 0x4d4   :  { %1736 = shalt.err (!%p1733_p9)
}
 0x4d5   :  { %1067 = dma.vmem_to_hbm [thread:$0]  %s1065_s20, 256, %s3014_s6, [#allocation3]  }
 0x4d6   :  { %s1737_s0 = scalar_lea.vmem %s1085_s5, 128  ;;  %p1742_p11 = scmp.lt.s32.totalorder %s1085_s5, %s1085_s5 }
 0x4d7   :  { %p1738_p10 = scmp.ne.s32.totalorder %s1085_s5, %s1737_s0  ;;  %p1743_p12 = scmp.lt.s32.totalorder %s1737_s0, %s1737_s0 }
 0x4d9   :  { %p1744_p13 = por %p1743_p12, %p1742_p11 }
 0x4db   :  { %p1745_p0 = pnand %p1744_p13, %p1738_p10 }
 0x4dd   :  { %1748 = shalt.err (!%p1745_p0)
}
 0x4de   :  { %s1749_s11 = scalar_lea.hbm %s3016_s8, 128 }
 0x4df   :  { %p1750_p1 = scmp.ne.s32.totalorder %s3016_s8, %s1749_s11  ;;  %p1753_p2 = scmp.lt.u32.totalorder %s1749_s11, %s3016_s8 }
 0x4e1   :  { %p1755_p3 = pnand %p1753_p2, %p1750_p1 }
 0x4e3   :  { %1758 = shalt.err (!%p1755_p3)
}
 0x4e4   :  { %1087 = dma.vmem_to_hbm [thread:$0]  %s1085_s5, 128, %s3016_s8, [#allocation5]  }
 0x4e5   :  { %s1794_s4 = smov [#allocation9]  }
 0x4e6   :  { %s1104_s16 = sshll.u32 %s1794_s4, 4  ;;  %s1105_s16 = int_to_ptr.vmem [resolvable:$true] %s1104_s16 }
 0x4e7   :  { %s1759_s17 = scalar_lea.vmem %s1105_s16, 128  ;;  %p1764_p5 = scmp.lt.s32.totalorder %s1105_s16, %s1105_s16 }
 0x4e8   :  { %p1760_p4 = scmp.ne.s32.totalorder %s1105_s16, %s1759_s17  ;;  %p1765_p6 = scmp.lt.s32.totalorder %s1759_s17, %s1759_s17 }
 0x4ea   :  { %p1766_p7 = por %p1765_p6, %p1764_p5 }
 0x4ec   :  { %p1767_p8 = pnand %p1766_p7, %p1760_p4 }
 0x580   :  { %v1053_v0 = vpop.f32.mrb[8].mxu1 }
 0x581   :  { %1057 = vst [vmem:[#allocation9] sm:$0xff] %v1053_v0  ;;  %v1264_v1 = vpop.f32.mrb[9].mxu1 }
 0x582   :  { %1770 = shalt.err (!%p1767_p8)
}
 0x583   :  { %s1771_s19 = scalar_lea.hbm %s3018_s10, 128 }
 0x584   :  { %p1772_p9 = scmp.ne.s32.totalorder %s3018_s10, %s1771_s19  ;;  %p1775_p10 = scmp.lt.u32.totalorder %s1771_s19, %s3018_s10 }
 0x586   :  { %p1777_p11 = pnand %p1775_p10, %p1772_p9 }
 0x588   :  { %1780 = shalt.err (!%p1777_p11)
}
 0x589   :  { %1107 = dma.vmem_to_hbm [thread:$0]  %s1105_s16, 128, %s3018_s10, [#allocation8]  }
 0x58a   :  { %1781 = dma.done.wait [#allocation3], 256  }
 0x58b   :  { %1782 = vsyncadd [#allocation3], 4294967040 }
 0x58c   :  { %1783 = dma.done.wait [#allocation5], 384  }
 0x58d   :  { %1784 = vsyncadd [#allocation5], 4294966912 }
 0x58e   :  { %1785 = dma.done.wait [#allocation8], 256  }
 0x58f   :  { %1786 = vsyncadd [#allocation8], 4294967040 }
 0x590   :  { %1123 = vsyncpa [#allocation3], 1 }
 0x591   :  { %1124 = vsyncpa [#allocation5], 1 }
 0x592   :  { %1125 = vsyncpa [#allocation8], 1 }

</bundles_post_ra>
